<compile_context>
chip_gen: v6e
topology: v6e:2x2x1
jax: 0.10.0
libtpu: 0.0.40
codegen_flags: <defaults>
</compile_context>

<pallas_src>
import functools
import math

import jax
import jax.numpy as jnp
from jax import lax
from jax.experimental import pallas as pl
from jax.experimental.pallas import tpu as pltpu


def _round_up(x, m):
    return ((x + m - 1) // m) * m


def _vmem_capacity_bytes():
    """Physical VMEM per TensorCore; conservative fallback if the query fails."""
    try:
        info = pltpu.get_tpu_info()
        cap = getattr(info, "vmem_capacity_bytes", None)
        if cap:
            return int(cap)
    except Exception:
        pass
    return 64 * 2 ** 20  # v7x-sized fallback (safe everywhere)


# ---------------------------------------------------------------------------
# Pallas kernel 1: fused per-stage 1x1 conv + BN + ReLU (grid over stages)
# ---------------------------------------------------------------------------

def _stage_matmul_kernel(x_ref, w_ref, scale_ref, bias_ref, o_ref):
    # x_ref: [Mpad, Cin_pad] bf16, w_ref: [Cin_pad, Cs_pad] bf16,
    # scale/bias: [1, Cs_pad] f32, o_ref: [Mpad, Cs_pad] f32
    y = jnp.dot(x_ref[...], w_ref[...], preferred_element_type=jnp.float32)
    y = y * scale_ref[...] + bias_ref[...]
    o_ref[...] = jnp.maximum(y, 0.0).astype(o_ref.dtype)


def stage_matmul_bn_relu(x_stack, w_stack, scale_stack, bias_stack):
    """All 4 pyramid stages in ONE pallas_call: grid=(S,), stage axis in the BlockSpecs."""
    S, Mpad, Cpad = x_stack.shape
    Cs_pad = w_stack.shape[-1]
    return pl.pallas_call(
        _stage_matmul_kernel,
        out_shape=jax.ShapeDtypeStruct((S, Mpad, Cs_pad), jnp.float32),
        grid=(S,),
        in_specs=[
            pl.BlockSpec((None, Mpad, Cpad), lambda s: (s, 0, 0)),
            pl.BlockSpec((None, Cpad, Cs_pad), lambda s: (s, 0, 0)),
            pl.BlockSpec((None, 1, Cs_pad), lambda s: (s, 0, 0)),
            pl.BlockSpec((None, 1, Cs_pad), lambda s: (s, 0, 0)),
        ],
        out_specs=pl.BlockSpec((None, Mpad, Cs_pad), lambda s: (s, 0, 0)),
        compiler_params=pltpu.CompilerParams(dimension_semantics=("parallel",)),
    )(x_stack, w_stack, scale_stack, bias_stack)


# ---------------------------------------------------------------------------
# Pallas kernel 2: tiled 3x3 conv + BN + ReLU (bottleneck)
# ---------------------------------------------------------------------------

def _conv3x3_bn_relu_kernel(x_ref, w_ref, scale_ref, bias_ref, o_ref, *, h, wk):
    # x_ref:  [(H+2)*Wk, 3*TCin] bf16  -- dx-expanded, spatially flattened input chunk
    # w_ref:  [3, 3*TCin, TCout] bf16  -- dy-indexed, dx folded into K
    # scale/bias: [1, TCout] f32
    # o_ref:  [H*Wk, TCout] f32        -- resident across the Cin-reduction grid axis
    ci = pl.program_id(2)

    @pl.when(ci == 0)
    def _():
        o_ref[...] = jnp.zeros_like(o_ref)

    # 3 MXU dots per step (K = 3*TCin, M = H*Wk); dy slices are sublane-aligned
    # (Wk is a multiple of 8) row windows of the same buffer. Accumulate straight
    # into the resident output block -- no multi-MB live accumulator value.
    for dy in range(3):
        xs = x_ref[pl.ds(dy * wk, h * wk)]
        o_ref[...] += jnp.dot(xs, w_ref[dy], preferred_element_type=jnp.float32)

    @pl.when(ci == pl.num_programs(2) - 1)
    def _():
        # Epilogue in f32 (v5e has no bf16 VPU path).
        o_ref[...] = jnp.maximum(o_ref[...] * scale_ref[...] + bias_ref[...], 0.0)


def _pick_tile(total, cap):
    """Largest multiple of 128 <= cap that divides `total` (total is a 128-multiple)."""
    best, t = 128, 128
    while t <= min(total, cap):
        if total % t == 0:
            best = t
        t += 128
    return best


def _conv_tiles(h, wk, cin_pad, cout_pad, budget_bytes, cout_cap_init):
    """Pick (TCin, TCout) fitting the budget; shrink TCin first to preserve TCout
    (input HBM re-read count per sample = cout_pad / TCout)."""

    def est(tci, tco):
        return (2 * ((h + 2) * wk * 3 * tci * 2      # bf16 dx-expanded input block, 2-buffered
                     + 3 * 3 * tci * tco * 2         # bf16 weight block, 2-buffered
                     + 2 * tco * 4)                  # scale + bias
                + 2 * h * wk * tco * 4)              # f32 output/accumulator block, 2-buffered

    cin_cap = min(cin_pad, 512)                      # K = 3*TCin <= 1536 already fills the MXU
    cout_cap = min(cout_pad, cout_cap_init)
    while True:
        tcin = _pick_tile(cin_pad, cin_cap)
        tcout = _pick_tile(cout_pad, cout_cap)
        e = est(tcin, tcout)
        if e <= budget_bytes or (tcin == 128 and tcout == 128):
            return tcin, tcout, e
        if tcin > 128:
            cin_cap = max(cin_cap // 2, 128)
        else:
            cout_cap = max(cout_cap // 2, 128)


def conv3x3_bn_relu(x_nhwc, w_hwio, scale, bias):
    """3x3 'same' conv (bias-free) + folded BN + ReLU, tiled over (N, Cout, Cin)."""
    N, H, W, Cin = x_nhwc.shape
    Cout = w_hwio.shape[-1]
    cin_pad = _round_up(Cin, 128)
    cout_pad = _round_up(Cout, 128)
    Wk = _round_up(W, 8)                             # lane/sublane-friendly interior width

    # Generation-aware VMEM budgeting (v5e/v6e: 128 MiB physical, v7x: 64 MiB).
    phys = _vmem_capacity_bytes()
    vmem_limit = min((phys * 3) // 4, 96 * 2 ** 20)
    budget = (vmem_limit * 13) // 20                 # leave headroom for compiler scratch

    # Guarantee >= 2 "parallel" grid blocks for the v7x dual TensorCore.
    cout_cap_init = 512
    if N == 1 and cout_pad >= 256:
        cout_cap_init = min(cout_cap_init, cout_pad // 2)

    tcin, tcout, est = _conv_tiles(H, Wk, cin_pad, cout_pad, budget, cout_cap_init)
    num_ci = cin_pad // tcin
    if est > vmem_limit:                             # minimal-tile fallback overshot the budget
        vmem_limit = min((phys * 7) // 8, est + est // 4)
    vmem_limit = max(vmem_limit, 16 * 2 ** 20)

    # --- wrapper-side layout prep -------------------------------------------------
    # Zero halo + channel pad, bf16 at the kernel boundary.
    x_halo = jnp.pad(x_nhwc.astype(jnp.bfloat16),
                     ((0, 0), (1, 1), (1, Wk - W + 1), (0, cin_pad - Cin)))
    # dx-expansion ordered per Cin chunk: last-dim index = ci*(3*TCin) + dx*TCin + c,
    # so each Cin-chunk block is contiguous and carries its own 3 dx taps (K = 3*TCin).
    shifted = jnp.stack([x_halo[:, :, dx:dx + Wk, :] for dx in range(3)], axis=3)
    x_exp = shifted.reshape(N, H + 2, Wk, 3, num_ci, tcin)
    x_exp = jnp.transpose(x_exp, (0, 1, 2, 4, 3, 5))
    x_exp = x_exp.reshape(N, (H + 2) * Wk, num_ci * 3 * tcin)

    # Weights reordered to match: w2[ci, dy, dx*TCin + c, o] = w[dy, dx, ci*TCin + c, o].
    w_pad = jnp.pad(w_hwio, ((0, 0), (0, 0), (0, cin_pad - Cin), (0, cout_pad - Cout)))
    w2 = w_pad.reshape(3, 3, num_ci, tcin, cout_pad)
    w2 = jnp.transpose(w2, (2, 0, 1, 3, 4)).reshape(num_ci, 3, 3 * tcin, cout_pad)
    w2 = w2.astype(jnp.bfloat16)

    scale_pad = jnp.pad(scale, (0, cout_pad - Cout)).reshape(1, cout_pad)
    bias_pad = jnp.pad(bias, (0, cout_pad - Cout)).reshape(1, cout_pad)

    grid = (N, cout_pad // tcout, num_ci)
    kernel = functools.partial(_conv3x3_bn_relu_kernel, h=H, wk=Wk)

    out = pl.pallas_call(
        kernel,
        out_shape=jax.ShapeDtypeStruct((N, H * Wk, cout_pad), jnp.float32),
        grid=grid,
        in_specs=[
            pl.BlockSpec((None, (H + 2) * Wk, 3 * tcin), lambda n, co, ci: (n, 0, ci)),
            pl.BlockSpec((None, 3, 3 * tcin, tcout), lambda n, co, ci: (ci, 0, 0, co)),
            pl.BlockSpec((1, tcout), lambda n, co, ci: (0, co)),
            pl.BlockSpec((1, tcout), lambda n, co, ci: (0, co)),
        ],
        out_specs=pl.BlockSpec((None, H * Wk, tcout), lambda n, co, ci: (n, 0, co)),
        compiler_params=pltpu.CompilerParams(
            dimension_semantics=("parallel", "parallel", "arbitrary"),
            vmem_limit_bytes=int(vmem_limit)),
    )(x_exp, w2, scale_pad, bias_pad)

    out = out.reshape(N, H, Wk, cout_pad)
    return out[:, :, :W, :Cout]


# ---------------------------------------------------------------------------
# Glue: exact adaptive-avg-pool / bilinear(align_corners=True) mixing matrices
# ---------------------------------------------------------------------------

def adaptive_pool_matrix(in_size, out_size):
    """Row-stochastic [out_size, in_size] matrix matching nn.AdaptiveAvgPool2d."""
    rows = []
    for i in range(out_size):
        start = (i * in_size) // out_size
        end = -(-((i + 1) * in_size) // out_size)          # ceil
        row = [0.0] * in_size
        for j in range(start, end):
            row[j] = 1.0 / (end - start)
        rows.append(row)
    return jnp.array(rows, dtype=jnp.float32)


def bilinear_matrix(out_size, in_size):
    """[out_size, in_size] bilinear interp weights, align_corners=True."""
    rows = []
    for h in range(out_size):
        row = [0.0] * in_size
        if in_size == 1 or out_size == 1:
            row[0] = 1.0
        else:
            s = h * (in_size - 1) / (out_size - 1)
            i0 = min(int(math.floor(s)), in_size - 1)
            i1 = min(i0 + 1, in_size - 1)
            f = s - i0
            row[i0] += 1.0 - f
            row[i1] += f
        rows.append(row)
    return jnp.array(rows, dtype=jnp.float32)


# ---------------------------------------------------------------------------
# PSPModule forward (Pallas) and pure-JAX reference
# ---------------------------------------------------------------------------

def psp_forward(params, x_nchw, bin_sizes=(1, 2, 4, 6)):
    N, C, H, W = x_nchw.shape
    x = jnp.transpose(x_nchw, (0, 2, 3, 1))                 # NCHW -> NHWC, f32
    Cs = params['stage_w'][0].shape[1]

    # Adaptive average pooling: one pass over x for all stages (stacked H-mixers).
    Ph_all = jnp.concatenate([adaptive_pool_matrix(H, b) for b in bin_sizes], axis=0)
    xh = jnp.einsum('nhwc,ph->npwc', x, Ph_all)             # (N, sum_b, W, C)

    # Pack all 4 stages into one padded (S, Mpad, Cpad) slab for a single pallas_call.
    # Mpad rounded to 16 for bf16 sublane packing.
    Mpad = _round_up(N * max(bin_sizes) ** 2, 16)
    Cpad = _round_up(C, 128)
    Cs_pad = _round_up(Cs, 128)

    pooled_stack = []
    off = 0
    for b in bin_sizes:
        Pw = adaptive_pool_matrix(W, b)
        pooled = jnp.einsum('npwc,qw->npqc', xh[:, off:off + b], Pw)   # (N,b,b,C)
        off += b
        flat = pooled.reshape(N * b * b, C)
        pooled_stack.append(jnp.pad(flat, ((0, Mpad - N * b * b), (0, Cpad - C))))
    pooled_stack = jnp.stack(pooled_stack).astype(jnp.bfloat16)        # (S,Mpad,Cpad)

    w_stack = jnp.stack([jnp.pad(w, ((0, Cpad - C), (0, Cs_pad - Cs)))
                         for w in params['stage_w']]).astype(jnp.bfloat16)
    scale_stack = jnp.stack([jnp.pad(s, (0, Cs_pad - Cs)).reshape(1, Cs_pad)
                             for s in params['stage_scale']])
    bias_stack = jnp.stack([jnp.pad(s, (0, Cs_pad - Cs)).reshape(1, Cs_pad)
                            for s in params['stage_bias']])

    y_stack = stage_matmul_bn_relu(pooled_stack, w_stack, scale_stack, bias_stack)

    # Bilinear upsample (align_corners=True) + concat, carried in bf16.
    pyramids = [x.astype(jnp.bfloat16)]
    for idx, b in enumerate(bin_sizes):
        y = y_stack[idx, :N * b * b, :Cs].reshape(N, b, b, Cs)
        Uh, Uw = bilinear_matrix(H, b), bilinear_matrix(W, b)
        up = jnp.einsum('npqc,hp,wq->nhwc', y, Uh, Uw)
        pyramids.append(up.astype(jnp.bfloat16))
    cat = jnp.concatenate(pyramids, axis=-1)                # (N, H, W, C + S*Cs) bf16
    # TODO(synk): fold the upsample/concat into the bottleneck kernel (split its Cin
    #             reduction over the pyramid pieces) to remove this HBM round trip.

    out = conv3x3_bn_relu(cat, params['bottleneck_w'],
                          params['bottleneck_scale'], params['bottleneck_bias'])
    # Dropout2d(0.1): identity in eval mode.
    return jnp.transpose(out, (0, 3, 1, 2))                 # NHWC -> NCHW


def psp_forward_ref(params, x_nchw, bin_sizes=(1, 2, 4, 6)):
    N, C, H, W = x_nchw.shape
    x = jnp.transpose(x_nchw, (0, 2, 3, 1))
    pyramids = [x]
    for idx, b in enumerate(bin_sizes):
        Ph, Pw = adaptive_pool_matrix(H, b), adaptive_pool_matrix(W, b)
        pooled = jnp.einsum('nhwc,ph,qw->npqc', x, Ph, Pw)
        y = jnp.einsum('npqc,cd->npqd', pooled, params['stage_w'][idx])
        y = jnp.maximum(y * params['stage_scale'][idx] + params['stage_bias'][idx], 0.0)
        Uh, Uw = bilinear_matrix(H, b), bilinear_matrix(W, b)
        pyramids.append(jnp.einsum('npqc,hp,wq->nhwc', y, Uh, Uw))
    cat = jnp.concatenate(pyramids, axis=-1)
    out = jax.lax.conv_general_dilated(
        cat, params['bottleneck_w'], window_strides=(1, 1), padding='SAME',
        dimension_numbers=('NHWC', 'HWIO', 'NHWC'))
    out = jnp.maximum(out * params['bottleneck_scale'] + params['bottleneck_bias'], 0.0)
    return jnp.transpose(out, (0, 3, 1, 2))


def init_params(key, C, bin_sizes):
    """Deterministic synthetic weights matching the PyTorch module's shapes."""
    eps = 1e-5
    n_stage = len(bin_sizes)
    Cs = C // n_stage
    keys = jax.random.split(key, n_stage + 1)
    stage_w, stage_scale, stage_bias = [], [], []
    for i in range(n_stage):
        # PyTorch Conv2d weight [Cs, C, 1, 1]  ->  [C, Cs] for NHWC matmul
        w = jax.random.normal(keys[i], (C, Cs), jnp.float32) / jnp.sqrt(jnp.float32(C))
        gamma = 1.0 + 0.1 * jnp.arange(Cs, dtype=jnp.float32) / max(Cs - 1, 1)
        beta = 0.05 * jnp.arange(Cs, dtype=jnp.float32)
        rmean = jnp.full((Cs,), 0.01 * i, jnp.float32)
        rvar = jnp.ones((Cs,), jnp.float32)
        scale = gamma / jnp.sqrt(rvar + eps)
        stage_w.append(w)
        stage_scale.append(scale)
        stage_bias.append(beta - rmean * scale)
    Cin_b = C + Cs * n_stage
    # PyTorch Conv2d weight [C, Cin_b, 3, 3]  ->  HWIO [3, 3, Cin_b, C]
    wb = jax.random.normal(keys[-1], (3, 3, Cin_b, C), jnp.float32) / jnp.sqrt(
        jnp.float32(9 * Cin_b))
    gamma_b = 1.0 + 0.1 * jnp.arange(C, dtype=jnp.float32) / max(C - 1, 1)
    beta_b = -0.02 * jnp.arange(C, dtype=jnp.float32)
    scale_b = gamma_b / jnp.sqrt(jnp.ones((C,), jnp.float32) + eps)
    bias_b = beta_b - jnp.zeros((C,), jnp.float32) * scale_b
    return dict(stage_w=stage_w, stage_scale=stage_scale, stage_bias=stage_bias,
                bottleneck_w=wb, bottleneck_scale=scale_b, bottleneck_bias=bias_b)


if __name__ == "__main__":
    key = jax.random.PRNGKey(0)
    N, C, H, W = 2, 16, 16, 16                  # in_channels=16 -> 4 channels per stage
    bin_sizes = (1, 2, 4, 6)

    kx, kp = jax.random.split(key)
    x = jax.random.normal(kx, (N, C, H, W), jnp.float32)   # NCHW like PyTorch
    params = init_params(kp, C, bin_sizes)

    fwd = jax.jit(lambda p, xx: psp_forward(p, xx, bin_sizes))
    out = jax.block_until_ready(fwd(params, x))

    ref = psp_forward_ref(params, x, bin_sizes)

    assert out.shape == (N, C, H, W), out.shape
    assert bool(jnp.all(jnp.isfinite(out)))
    # bf16 MXU inputs with f32 accumulation: tolerance loosened slightly vs pure f32.
    assert bool(jnp.allclose(out, ref, rtol=2e-2, atol=3e-2)), float(
        jnp.max(jnp.abs(out - ref)))
    print("KERNEL_OK")
</pallas_src>

<mosaic_0001>
module attributes {stable_mosaic.version = 11 : i64} {
  func.func @_stage_matmul_kernel(%arg0: i32, %arg1: memref<1x80x128xbf16, #tpu.memory_space<vmem>>, %arg2: memref<1x128x128xbf16, #tpu.memory_space<vmem>>, %arg3: memref<1x1x128xf32, #tpu.memory_space<vmem>>, %arg4: memref<1x1x128xf32, #tpu.memory_space<vmem>>, %arg5: memref<1x80x128xf32, #tpu.memory_space<vmem>>) attributes {dimension_semantics = [#tpu.dimension_semantics<parallel>], iteration_bounds = array<i64: 4>, scalar_prefetch = 0 : i64, scratch_operands = 0 : i64, tpu.core_type = #tpu.core_type<tc>, window_params = [{transform_indices = @transform_0, window_bounds = array<i64: 1, 80, 128>}, {transform_indices = @transform_1, window_bounds = array<i64: 1, 128, 128>}, {transform_indices = @transform_2, window_bounds = array<i64: 1, 1, 128>}, {transform_indices = @transform_3, window_bounds = array<i64: 1, 1, 128>}, {transform_indices = @transform_4, window_bounds = array<i64: 1, 80, 128>}]} {
    %c0 = arith.constant 0 : index
    %c0_0 = arith.constant 0 : index
    %c0_1 = arith.constant 0 : index
    %0 = vector.load %arg1[%c0, %c0_0, %c0_1] : memref<1x80x128xbf16, #tpu.memory_space<vmem>>, vector<1x80x128xbf16>
    %1 = vector.shape_cast %0 : vector<1x80x128xbf16> to vector<80x128xbf16>
    %c0_2 = arith.constant 0 : index
    %c0_3 = arith.constant 0 : index
    %c0_4 = arith.constant 0 : index
    %2 = vector.load %arg2[%c0_2, %c0_3, %c0_4] : memref<1x128x128xbf16, #tpu.memory_space<vmem>>, vector<1x128x128xbf16>
    %3 = vector.shape_cast %2 : vector<1x128x128xbf16> to vector<128x128xbf16>
    %cst = arith.constant dense<0.000000e+00> : vector<80x128xf32>
    %4 = tpu.matmul %1, %3, %cst {dimension_numbers = #tpu.dot_dimension_numbers<[1], [0], [0], [1], [0, 0, 1, 1], [], []>} : vector<80x128xbf16>, vector<128x128xbf16>, vector<80x128xf32> -> vector<80x128xf32>
    %c0_5 = arith.constant 0 : index
    %c0_6 = arith.constant 0 : index
    %c0_7 = arith.constant 0 : index
    %5 = vector.load %arg3[%c0_5, %c0_6, %c0_7] : memref<1x1x128xf32, #tpu.memory_space<vmem>>, vector<1x1x128xf32>
    %6 = vector.shape_cast %5 : vector<1x1x128xf32> to vector<1x128xf32>
    %7 = vector.broadcast %6 : vector<1x128xf32> to vector<80x128xf32>
    %8 = arith.mulf %4, %7 : vector<80x128xf32>
    %c0_8 = arith.constant 0 : index
    %c0_9 = arith.constant 0 : index
    %c0_10 = arith.constant 0 : index
    %9 = vector.load %arg4[%c0_8, %c0_9, %c0_10] : memref<1x1x128xf32, #tpu.memory_space<vmem>>, vector<1x1x128xf32>
    %10 = vector.shape_cast %9 : vector<1x1x128xf32> to vector<1x128xf32>
    %11 = vector.broadcast %10 : vector<1x128xf32> to vector<80x128xf32>
    %12 = arith.addf %8, %11 : vector<80x128xf32>
    %cst_11 = arith.constant 0.000000e+00 : f32
    %13 = vector.broadcast %cst_11 : f32 to vector<80x128xf32>
    %14 = arith.maximumf %12, %13 : vector<80x128xf32>
    %c0_12 = arith.constant 0 : index
    %c0_13 = arith.constant 0 : index
    %c0_14 = arith.constant 0 : index
    %15 = vector.load %arg5[%c0_12, %c0_13, %c0_14] : memref<1x80x128xf32, #tpu.memory_space<vmem>>, vector<1x80x128xf32>
    %16 = vector.shape_cast %15 : vector<1x80x128xf32> to vector<80x128xf32>
    %17 = vector.shape_cast %14 : vector<80x128xf32> to vector<1x80x128xf32>
    tpu.vector_store %arg5[%c0_12, %c0_13, %c0_14], %17 {strides = array<i32>} : memref<1x80x128xf32, #tpu.memory_space<vmem>>, vector<1x80x128xf32>,
    return
  }
  func.func @transform_0(%arg0: i32) -> (i32, i32, i32) {
    %c0_i32 = arith.constant 0 : i32
    %c0_i32_0 = arith.constant 0 : i32
    %c0_i32_1 = arith.constant 0 : i32
    return %arg0, %c0_i32, %c0_i32_0 : i32, i32, i32
  }
  func.func @transform_1(%arg0: i32) -> (i32, i32, i32) {
    %c0_i32 = arith.constant 0 : i32
    %c0_i32_0 = arith.constant 0 : i32
    %c0_i32_1 = arith.constant 0 : i32
    return %arg0, %c0_i32, %c0_i32_0 : i32, i32, i32
  }
  func.func @transform_2(%arg0: i32) -> (i32, i32, i32) {
    %c0_i32 = arith.constant 0 : i32
    %c0_i32_0 = arith.constant 0 : i32
    %c0_i32_1 = arith.constant 0 : i32
    return %arg0, %c0_i32, %c0_i32_0 : i32, i32, i32
  }
  func.func @transform_3(%arg0: i32) -> (i32, i32, i32) {
    %c0_i32 = arith.constant 0 : i32
    %c0_i32_0 = arith.constant 0 : i32
    %c0_i32_1 = arith.constant 0 : i32
    return %arg0, %c0_i32, %c0_i32_0 : i32, i32, i32
  }
  func.func @transform_4(%arg0: i32) -> (i32, i32, i32) {
    %c0_i32 = arith.constant 0 : i32
    %c0_i32_0 = arith.constant 0 : i32
    %c0_i32_1 = arith.constant 0 : i32
    return %arg0, %c0_i32, %c0_i32_0 : i32, i32, i32
  }
}

module attributes {stable_mosaic.version = 11 : i64} {
  func.func @_conv3x3_bn_relu_kernel(%arg0: i32, %arg1: i32, %arg2: i32, %arg3: memref<1x288x384xbf16, #tpu.memory_space<vmem>>, %arg4: memref<1x3x384x128xbf16, #tpu.memory_space<vmem>>, %arg5: memref<1x128xf32, #tpu.memory_space<vmem>>, %arg6: memref<1x128xf32, #tpu.memory_space<vmem>>, %arg7: memref<1x256x128xf32, #tpu.memory_space<vmem>>) attributes {dimension_semantics = [#tpu.dimension_semantics<parallel>, #tpu.dimension_semantics<parallel>, #tpu.dimension_semantics<arbitrary>], iteration_bounds = array<i64: 2, 1, 1>, scalar_prefetch = 0 : i64, scratch_operands = 0 : i64, tpu.core_type = #tpu.core_type<tc>, window_params = [{transform_indices = @transform_0, window_bounds = array<i64: 1, 288, 384>}, {transform_indices = @transform_1, window_bounds = array<i64: 1, 3, 384, 128>}, {transform_indices = @transform_2, window_bounds = array<i64: 1, 128>}, {transform_indices = @transform_3, window_bounds = array<i64: 1, 128>}, {transform_indices = @transform_4, window_bounds = array<i64: 1, 256, 128>}]} {
    %c0_i32 = arith.constant 0 : i32
    %0 = arith.cmpi eq, %arg2, %c0_i32 : i32
    %1 = arith.extui %0 : i1 to i32
    %c0_i32_0 = arith.constant 0 : i32
    %2 = arith.cmpi ne, %1, %c0_i32_0 : i32
    scf.if %2 {
      %cst_39 = arith.constant 0.000000e+00 : f32
      %39 = vector.broadcast %cst_39 : f32 to vector<256x128xf32>
      %c0_40 = arith.constant 0 : index
      %c0_41 = arith.constant 0 : index
      %c0_42 = arith.constant 0 : index
      %40 = vector.load %arg7[%c0_40, %c0_41, %c0_42] : memref<1x256x128xf32, #tpu.memory_space<vmem>>, vector<1x256x128xf32>
      %41 = vector.shape_cast %40 : vector<1x256x128xf32> to vector<256x128xf32>
      %42 = vector.shape_cast %39 : vector<256x128xf32> to vector<1x256x128xf32>
      tpu.vector_store %arg7[%c0_40, %c0_41, %c0_42], %42 {strides = array<i32>} : memref<1x256x128xf32, #tpu.memory_space<vmem>>, vector<1x256x128xf32>,
    } else {
    }
    %c0 = arith.constant 0 : index
    %c0_1 = arith.constant 0 : index
    %c0_2 = arith.constant 0 : index
    %3 = vector.load %arg3[%c0, %c0_1, %c0_2] : memref<1x288x384xbf16, #tpu.memory_space<vmem>>, vector<1x256x384xbf16>
    %4 = vector.shape_cast %3 : vector<1x256x384xbf16> to vector<256x384xbf16>
    %c0_3 = arith.constant 0 : index
    %c0_4 = arith.constant 0 : index
    %c0_5 = arith.constant 0 : index
    %5 = vector.load %arg7[%c0_3, %c0_4, %c0_5] : memref<1x256x128xf32, #tpu.memory_space<vmem>>, vector<1x256x128xf32>
    %6 = vector.shape_cast %5 : vector<1x256x128xf32> to vector<256x128xf32>
    %c0_6 = arith.constant 0 : index
    %c0_7 = arith.constant 0 : index
    %c0_8 = arith.constant 0 : index
    %c0_9 = arith.constant 0 : index
    %7 = vector.load %arg4[%c0_6, %c0_7, %c0_8, %c0_9] : memref<1x3x384x128xbf16, #tpu.memory_space<vmem>>, vector<1x1x384x128xbf16>
    %8 = vector.shape_cast %7 : vector<1x1x384x128xbf16> to vector<384x128xbf16>
    %cst = arith.constant dense<0.000000e+00> : vector<256x128xf32>
    %9 = tpu.matmul %4, %8, %cst {dimension_numbers = #tpu.dot_dimension_numbers<[1], [0], [0], [1], [0, 0, 1, 1], [], []>} : vector<256x384xbf16>, vector<384x128xbf16>, vector<256x128xf32> -> vector<256x128xf32>
    %10 = arith.addf %6, %9 : vector<256x128xf32>
    %c0_10 = arith.constant 0 : index
    %c0_11 = arith.constant 0 : index
    %c0_12 = arith.constant 0 : index
    %11 = vector.load %arg7[%c0_10, %c0_11, %c0_12] : memref<1x256x128xf32, #tpu.memory_space<vmem>>, vector<1x256x128xf32>
    %12 = vector.shape_cast %11 : vector<1x256x128xf32> to vector<256x128xf32>
    %13 = vector.shape_cast %10 : vector<256x128xf32> to vector<1x256x128xf32>
    tpu.vector_store %arg7[%c0_10, %c0_11, %c0_12], %13 {strides = array<i32>} : memref<1x256x128xf32, #tpu.memory_space<vmem>>, vector<1x256x128xf32>,
    %c0_13 = arith.constant 0 : index
    %c16 = arith.constant 16 : index
    %c0_14 = arith.constant 0 : index
    %14 = vector.load %arg3[%c0_13, %c16, %c0_14] : memref<1x288x384xbf16, #tpu.memory_space<vmem>>, vector<1x256x384xbf16>
    %15 = vector.shape_cast %14 : vector<1x256x384xbf16> to vector<256x384xbf16>
    %c0_15 = arith.constant 0 : index
    %c0_16 = arith.constant 0 : index
    %c0_17 = arith.constant 0 : index
    %16 = vector.load %arg7[%c0_15, %c0_16, %c0_17] : memref<1x256x128xf32, #tpu.memory_space<vmem>>, vector<1x256x128xf32>
    %17 = vector.shape_cast %16 : vector<1x256x128xf32> to vector<256x128xf32>
    %c0_18 = arith.constant 0 : index
    %c1 = arith.constant 1 : index
    %c0_19 = arith.constant 0 : index
    %c0_20 = arith.constant 0 : index
    %18 = vector.load %arg4[%c0_18, %c1, %c0_19, %c0_20] : memref<1x3x384x128xbf16, #tpu.memory_space<vmem>>, vector<1x1x384x128xbf16>
    %19 = vector.shape_cast %18 : vector<1x1x384x128xbf16> to vector<384x128xbf16>
    %cst_21 = arith.constant dense<0.000000e+00> : vector<256x128xf32>
    %20 = tpu.matmul %15, %19, %cst_21 {dimension_numbers = #tpu.dot_dimension_numbers<[1], [0], [0], [1], [0, 0, 1, 1], [], []>} : vector<256x384xbf16>, vector<384x128xbf16>, vector<256x128xf32> -> vector<256x128xf32>
    %21 = arith.addf %17, %20 : vector<256x128xf32>
    %c0_22 = arith.constant 0 : index
    %c0_23 = arith.constant 0 : index
    %c0_24 = arith.constant 0 : index
    %22 = vector.load %arg7[%c0_22, %c0_23, %c0_24] : memref<1x256x128xf32, #tpu.memory_space<vmem>>, vector<1x256x128xf32>
    %23 = vector.shape_cast %22 : vector<1x256x128xf32> to vector<256x128xf32>
    %24 = vector.shape_cast %21 : vector<256x128xf32> to vector<1x256x128xf32>
    tpu.vector_store %arg7[%c0_22, %c0_23, %c0_24], %24 {strides = array<i32>} : memref<1x256x128xf32, #tpu.memory_space<vmem>>, vector<1x256x128xf32>,
    %c0_25 = arith.constant 0 : index
    %c32 = arith.constant 32 : index
    %c0_26 = arith.constant 0 : index
    %25 = vector.load %arg3[%c0_25, %c32, %c0_26] : memref<1x288x384xbf16, #tpu.memory_space<vmem>>, vector<1x256x384xbf16>
    %26 = vector.shape_cast %25 : vector<1x256x384xbf16> to vector<256x384xbf16>
    %c0_27 = arith.constant 0 : index
    %c0_28 = arith.constant 0 : index
    %c0_29 = arith.constant 0 : index
    %27 = vector.load %arg7[%c0_27, %c0_28, %c0_29] : memref<1x256x128xf32, #tpu.memory_space<vmem>>, vector<1x256x128xf32>
    %28 = vector.shape_cast %27 : vector<1x256x128xf32> to vector<256x128xf32>
    %c0_30 = arith.constant 0 : index
    %c2 = arith.constant 2 : index
    %c0_31 = arith.constant 0 : index
    %c0_32 = arith.constant 0 : index
    %29 = vector.load %arg4[%c0_30, %c2, %c0_31, %c0_32] : memref<1x3x384x128xbf16, #tpu.memory_space<vmem>>, vector<1x1x384x128xbf16>
    %30 = vector.shape_cast %29 : vector<1x1x384x128xbf16> to vector<384x128xbf16>
    %cst_33 = arith.constant dense<0.000000e+00> : vector<256x128xf32>
    %31 = tpu.matmul %26, %30, %cst_33 {dimension_numbers = #tpu.dot_dimension_numbers<[1], [0], [0], [1], [0, 0, 1, 1], [], []>} : vector<256x384xbf16>, vector<384x128xbf16>, vector<256x128xf32> -> vector<256x128xf32>
    %32 = arith.addf %28, %31 : vector<256x128xf32>
    %c0_34 = arith.constant 0 : index
    %c0_35 = arith.constant 0 : index
    %c0_36 = arith.constant 0 : index
    %33 = vector.load %arg7[%c0_34, %c0_35, %c0_36] : memref<1x256x128xf32, #tpu.memory_space<vmem>>, vector<1x256x128xf32>
    %34 = vector.shape_cast %33 : vector<1x256x128xf32> to vector<256x128xf32>
    %35 = vector.shape_cast %32 : vector<256x128xf32> to vector<1x256x128xf32>
    tpu.vector_store %arg7[%c0_34, %c0_35, %c0_36], %35 {strides = array<i32>} : memref<1x256x128xf32, #tpu.memory_space<vmem>>, vector<1x256x128xf32>,
    %c0_i32_37 = arith.constant 0 : i32
    %36 = arith.cmpi eq, %arg2, %c0_i32_37 : i32
    %37 = arith.extui %36 : i1 to i32
    %c0_i32_38 = arith.constant 0 : i32
    %38 = arith.cmpi ne, %37, %c0_i32_38 : i32
    scf.if %38 {
      %c0_39 = arith.constant 0 : index
      %c0_40 = arith.constant 0 : index
      %c0_41 = arith.constant 0 : index
      %39 = vector.load %arg7[%c0_39, %c0_40, %c0_41] : memref<1x256x128xf32, #tpu.memory_space<vmem>>, vector<1x256x128xf32>
      %40 = vector.shape_cast %39 : vector<1x256x128xf32> to vector<256x128xf32>
      %c0_42 = arith.constant 0 : index
      %c0_43 = arith.constant 0 : index
      %41 = vector.load %arg5[%c0_42, %c0_43] : memref<1x128xf32, #tpu.memory_space<vmem>>, vector<1x128xf32>
      %42 = vector.broadcast %41 : vector<1x128xf32> to vector<256x128xf32>
      %43 = arith.mulf %40, %42 : vector<256x128xf32>
      %c0_44 = arith.constant 0 : index
      %c0_45 = arith.constant 0 : index
      %44 = vector.load %arg6[%c0_44, %c0_45] : memref<1x128xf32, #tpu.memory_space<vmem>>, vector<1x128xf32>
      %45 = vector.broadcast %44 : vector<1x128xf32> to vector<256x128xf32>
      %46 = arith.addf %43, %45 : vector<256x128xf32>
      %cst_46 = arith.constant 0.000000e+00 : f32
      %47 = vector.broadcast %cst_46 : f32 to vector<256x128xf32>
      %48 = arith.maximumf %46, %47 : vector<256x128xf32>
      %c0_47 = arith.constant 0 : index
      %c0_48 = arith.constant 0 : index
      %c0_49 = arith.constant 0 : index
      %49 = vector.load %arg7[%c0_47, %c0_48, %c0_49] : memref<1x256x128xf32, #tpu.memory_space<vmem>>, vector<1x256x128xf32>
      %50 = vector.shape_cast %49 : vector<1x256x128xf32> to vector<256x128xf32>
      %51 = vector.shape_cast %48 : vector<256x128xf32> to vector<1x256x128xf32>
      tpu.vector_store %arg7[%c0_47, %c0_48, %c0_49], %51 {strides = array<i32>} : memref<1x256x128xf32, #tpu.memory_space<vmem>>, vector<1x256x128xf32>,
    } else {
    }
    return
  }
  func.func @transform_0(%arg0: i32, %arg1: i32, %arg2: i32) -> (i32, i32, i32) {
    %c0_i32 = arith.constant 0 : i32
    %c0_i32_0 = arith.constant 0 : i32
    return %arg0, %c0_i32, %arg2 : i32, i32, i32
  }
  func.func @transform_1(%arg0: i32, %arg1: i32, %arg2: i32) -> (i32, i32, i32, i32) {
    %c0_i32 = arith.constant 0 : i32
    %c0_i32_0 = arith.constant 0 : i32
    %c0_i32_1 = arith.constant 0 : i32
    return %arg2, %c0_i32, %c0_i32_0, %arg1 : i32, i32, i32, i32
  }
  func.func @transform_2(%arg0: i32, %arg1: i32, %arg2: i32) -> (i32, i32) {
    %c0_i32 = arith.constant 0 : i32
    %c0_i32_0 = arith.constant 0 : i32
    return %c0_i32, %arg1 : i32, i32
  }
  func.func @transform_3(%arg0: i32, %arg1: i32, %arg2: i32) -> (i32, i32) {
    %c0_i32 = arith.constant 0 : i32
    %c0_i32_0 = arith.constant 0 : i32
    return %c0_i32, %arg1 : i32, i32
  }
  func.func @transform_4(%arg0: i32, %arg1: i32, %arg2: i32) -> (i32, i32, i32) {
    %c0_i32 = arith.constant 0 : i32
    %c0_i32_0 = arith.constant 0 : i32
    return %arg0, %c0_i32, %arg1 : i32, i32, i32
  }
}

</mosaic_0001>

<bundles_post_ra>
// kernel: squeeze.7
= control target key start
LH: loop header
LB: loop body
LE: loop exit
PB: predicated region body
PF: predicated region fallthrough
CT: control target
= control target key end

     0   :  { %s224_s8 = smov 110   ;;  %vm20_vm0 = vcmask 48128   ;;  %s225_s9 = smov 116   ;;  %s283_s0 = inlined_call_operand.vmem [shape: bf16[1,72,4], index: 0, kind: input, shape index: {}]   ;;  %s284_s1 = inlined_call_operand.vmem [shape: bf16[2,6,6,4], index: 1, kind: output, shape index: {}]  }
   0x1   :  { %v15_v0 = vld [vmem:[%s283_s0] sm:$0x3]  ;;  %s223_s0 = smov 122   ;;  %s226_s10 = smov 104  }
   0x2   :  { %v16_v1 = vunpack.c.l.bf16 %v15_v0  ;;  %s227_s11 = smov 98   ;;  %s228_s12 = smov 92  }
   0x3   :  { %s229_s13 = smov 86   ;;  %s230_s14 = smov 80  }
   0x4   :  { %18 = vst [vmem:[#allocation1] sm:$0xf] %v16_v1  ;;  %s231_s15 = smov 74   ;;  %s232_s16 = smov 68  }
   0x5   :  { %s233_s17 = smov 62  }
   0xb   :  { %v23_v2 = vld [vmem:[#allocation1] sm:$0xf]  }
   0xc   :  { %v39_v3 = vld [vmem:[#allocation1] sm:$0xf]   ;;  %24 = vrot.lane.b32.xlu0 %v23_v2, %s223_s0 }
   0xd   :  { %40 = vrot.lane.b32.xlu1 %v39_v3, %s224_s8  ;;  %v31_v4 = vld [vmem:[#allocation1] sm:$0xf]  }
   0xe   :  { %v47_v5 = vld [vmem:[#allocation1] sm:$0xf]  }
   0xf   :  { %v19_v6 = vld [vmem:[#allocation1] sm:$0xf]  }
  0x10   :  { %21 = vst.msk [vmem:[#allocation0] ss:$16 sm:$0x3] %vm20_vm0, %v19_v6   ;;  %22 = vst.msk [vmem:[#allocation0] ss:$16 sm:$0xc] %vm20_vm0, %v19_v6   ;;  %32 = vrot.lane.b32.xlu0 %v31_v4, %s225_s9 }
  0x11   :  { %48 = vrot.lane.b32.xlu1 %v47_v5, %s226_s10  ;;  %v55_v7 = vld [vmem:[#allocation1] sm:$0xf]  }
  0x12   :  { %v63_v8 = vld [vmem:[#allocation1] sm:$0xf]  }
  0x13   :  { %v71_v9 = vld [vmem:[#allocation1] sm:$0xf]  }
  0x14   :  { %56 = vrot.lane.b32.xlu0 %v55_v7, %s227_s11  ;;  %v79_v10 = vld [vmem:[#allocation1] sm:$0xf]  }
  0x15   :  { %64 = vrot.lane.b32.xlu1 %v63_v8, %s228_s12  ;;  %v87_v11 = vld [vmem:[#allocation1] sm:$0xf]  }
  0x16   :  { %v95_v12 = vld [vmem:[#allocation1] sm:$0xf]  }
  0x17   :  { %v103_v13 = vld [vmem:[#allocation1] sm:$0xf]  }
  0x18   :  { %72 = vrot.lane.b32.xlu0 %v71_v9, %s229_s13 }
  0x19   :  { %80 = vrot.lane.b32.xlu1 %v79_v10, %s230_s14 }
  0x1c   :  { %88 = vrot.lane.b32.xlu0 %v87_v11, %s231_s15 }
  0x1d   :  { %96 = vrot.lane.b32.xlu1 %v95_v12, %s232_s16 }
  0x20   :  { %104 = vrot.lane.b32.xlu0 %v103_v13, %s233_s17 }
  0x7e   :  { %v25_v14 = vpop.permute.xlu0 %24  }
  0x7f   :  { %v41_v15 = vpop.permute.xlu1 %40   ;;  %28 = vst.msk [vmem:[#allocation0 + $0x1] ss:$16 sm:$0x3] %vm20_vm0, %v25_v14   ;;  %30 = vst.msk [vmem:[#allocation0 + $0x1] ss:$16 sm:$0xc] %vm20_vm0, %v25_v14  }
  0x80   :  { %44 = vst.msk [vmem:[#allocation0 + $0x3] ss:$16 sm:$0x3] %vm20_vm0, %v41_v15   ;;  %46 = vst.msk [vmem:[#allocation0 + $0x3] ss:$16 sm:$0xc] %vm20_vm0, %v41_v15  }
  0x82   :  { %v33_v16 = vpop.permute.xlu0 %32  }
  0x83   :  { %v49_v17 = vpop.permute.xlu1 %48   ;;  %36 = vst.msk [vmem:[#allocation0 + $0x2] ss:$16 sm:$0x3] %vm20_vm0, %v33_v16   ;;  %38 = vst.msk [vmem:[#allocation0 + $0x2] ss:$16 sm:$0xc] %vm20_vm0, %v33_v16  }
  0x84   :  { %52 = vst.msk [vmem:[#allocation0 + $0x4] ss:$16 sm:$0x3] %vm20_vm0, %v49_v17   ;;  %54 = vst.msk [vmem:[#allocation0 + $0x4] ss:$16 sm:$0xc] %vm20_vm0, %v49_v17  }
  0x86   :  { %v57_v18 = vpop.permute.xlu0 %56  }
  0x87   :  { %v65_v19 = vpop.permute.xlu1 %64   ;;  %60 = vst.msk [vmem:[#allocation0 + $0x5] ss:$16 sm:$0x3] %vm20_vm0, %v57_v18   ;;  %62 = vst.msk [vmem:[#allocation0 + $0x5] ss:$16 sm:$0xc] %vm20_vm0, %v57_v18  }
  0x88   :  { %68 = vst.msk [vmem:[#allocation0 + $0x8] ss:$16 sm:$0x3] %vm20_vm0, %v65_v19   ;;  %70 = vst.msk [vmem:[#allocation0 + $0x8] ss:$16 sm:$0xc] %vm20_vm0, %v65_v19  }
  0x8a   :  { %v73_v20 = vpop.permute.xlu0 %72  }
  0x8b   :  { %v81_v21 = vpop.permute.xlu1 %80   ;;  %76 = vst.msk [vmem:[#allocation0 + $0x9] ss:$16 sm:$0x3] %vm20_vm0, %v73_v20   ;;  %78 = vst.msk [vmem:[#allocation0 + $0x9] ss:$16 sm:$0xc] %vm20_vm0, %v73_v20  }
  0x8c   :  { %84 = vst.msk [vmem:[#allocation0 + $0xa] ss:$16 sm:$0x3] %vm20_vm0, %v81_v21   ;;  %86 = vst.msk [vmem:[#allocation0 + $0xa] ss:$16 sm:$0xc] %vm20_vm0, %v81_v21  }
  0x8e   :  { %v89_v22 = vpop.permute.xlu0 %88   ;;  %v145_v25 = vld [vmem:[#allocation0 + $0x20] sm:$0xff]  ;;  %v129_v27 = vld [vmem:[#allocation0 + $0x10] sm:$0xff] }
  0x8f   :  { %v97_v23 = vpop.permute.xlu1 %96   ;;  %92 = vst.msk [vmem:[#allocation0 + $0xb] ss:$16 sm:$0x3] %vm20_vm0, %v89_v22   ;;  %94 = vst.msk [vmem:[#allocation0 + $0xb] ss:$16 sm:$0xc] %vm20_vm0, %v89_v22  }
  0x90   :  { %100 = vst.msk [vmem:[#allocation0 + $0xc] ss:$16 sm:$0x3] %vm20_vm0, %v97_v23   ;;  %102 = vst.msk [vmem:[#allocation0 + $0xc] ss:$16 sm:$0xc] %vm20_vm0, %v97_v23  }
  0x91   :  { %v116_v26 = vld [vmem:[#allocation0] sm:$0xff]  ;;  %v161_v31 = vld [vmem:[#allocation0 + $0x30] sm:$0xff] }
  0x92   :  { %v105_v24 = vpop.permute.xlu0 %104  }
  0x93   :  { %108 = vst.msk [vmem:[#allocation0 + $0xd] ss:$16 sm:$0x3] %vm20_vm0, %v105_v24   ;;  %110 = vst.msk [vmem:[#allocation0 + $0xd] ss:$16 sm:$0xc] %vm20_vm0, %v105_v24  }
  0x9a   :  { %v122_v28 = vld [vmem:[#allocation0 + $0x8] sm:$0xff]  ;;  %v137_v29 = vld [vmem:[#allocation0 + $0x18] sm:$0xff] }
  0x9b   :  { %v153_v30 = vld [vmem:[#allocation0 + $0x28] sm:$0xff]  ;;  %v192_v32 = vpack.c.bf16 %v122_v28, %v116_v26  ;;  %v197_v33 = vpack.c.bf16 %v137_v29, %v129_v27  ;;  %v169_v35 = vld [vmem:[#allocation0 + $0x38] sm:$0xff] }
  0x9c   :  { %v202_v34 = vpack.c.bf16 %v153_v30, %v145_v25  ;;  %v207_v36 = vpack.c.bf16 %v169_v35, %v161_v31 }
  0x9d   :  { %193 = vst [vmem:[%s284_s1] sm:$0xff] %v192_v32   ;;  %209 = vst [vmem:[%s284_s1 + $0x8] sm:$0xff] %v197_v33  }
  0x9e   :  { %210 = vst [vmem:[%s284_s1 + $0x10] sm:$0xff] %v202_v34   ;;  %211 = vst [vmem:[%s284_s1 + $0x18] sm:$0xff] %v207_v36  }

// kernel: _lambda_.2
= control target key start
LH: loop header
LB: loop body
LE: loop exit
PB: predicated region body
PF: predicated region fallthrough
CT: control target
= control target key end

     0   :  { %s715_s15 = smov 0   ;;  %s782_s0 = inlined_call_operand.vmem [shape: bf16[4,80,128], index: 0, kind: input, shape index: {}]   ;;  %s783_s1 = inlined_call_operand.vmem [shape: bf16[4,128,128], index: 1, kind: input, shape index: {}]   ;;  %s784_s2 = inlined_call_operand.vmem [shape: f32[4,1,128], index: 2, kind: input, shape index: {}]   ;;  %s785_s3 = inlined_call_operand.vmem [shape: f32[4,1,128], index: 3, kind: input, shape index: {}]   ;;  %s786_s4 = inlined_call_operand.vmem [shape: f32[4,80,128], index: 4, kind: output, shape index: {}]  }
   0x1 LB: > { %s563_s16 = sadd.s32 4294967295, %s686_s15   ;;  %p567_p0 = scmp.ge.s32.totalorder %s686_s15, 1  ;;  %s686_s15 = sphi %s715_s15, %s14_s15  }
   0x2   : > { %p188_p1 = scmp.lt.s32.totalorder %s686_s15, 5 }
   0x4   : > { %p189_p2 = pnand %p567_p0, %p188_p1 }
   0x5   : > { %p225_p3 = scmp.lt.s32.totalorder (!%p189_p2), %s563_s16, 3 }
   0x6   : > { %192 = sbr.rel (%p189_p2) target bundleno = 266 (0x10a), region = 36 }
   0xb   : > { %v688_v0 = vmov 0.0   ;;  %s788_s16 = smov (!%p225_p3, %s563_s16), 3  ;;  %vm689_vm0 = vmmov 0  }
   0xc   : > { %603 = vmatprep.subr.bf16.mxu0 %v688_v0  ;;  %639 = vmatprep.subr.bf16.mxu1 %v688_v0  ;;  %s589_s17 = sshll.u32 %s788_s16, 6  ;;  %s655_s21 = smul.u32 40, %s788_s16 }
   0xd   : > { %619 = vmatprep.mubr.msk.bf16.mxu0 %vm689_vm0, %v688_v0  ;;  %631 = vmatprep.mubr.msk.bf16.mxu1 %vm689_vm0, %v688_v0  ;;  %s731_s20 = scalar_lea.vmem %s783_s1, %s589_s17  ;;  %s237_s27 = scalar_lea.vmem %s784_s2, %s788_s16 }
   0xe   : > { %v667_v1 = vld [vmem:[%s731_s20 + $0x38] sm:$0xff]   ;;  %v668_v2 = vld [vmem:[%s731_s20 + $0x30] sm:$0xff]   ;;  %v669_v3 = vld [vmem:[%s731_s20 + $0x28] sm:$0xff]   ;;  %s740_s24 = scalar_lea.vmem %s782_s0, %s655_s21  ;;  %s240_s30 = scalar_lea.vmem %s785_s3, %s788_s16 }
   0xf   : > { %604 = vmatpush3.bf16.msra.mxu0 %v667_v1  ;;  %647 = vmatpush3.bf16.msra.mxu1 %v667_v1  ;;  %v670_v4 = vld [vmem:[%s731_s20 + $0x20] sm:$0xff]   ;;  %v671_v5 = vld [vmem:[%s731_s20 + $0x18] sm:$0xff]   ;;  %v672_v6 = vld [vmem:[%s731_s20 + $0x10] sm:$0xff]   ;;  %s656_s5 = smul.u32 80, %s788_s16 }
  0x10   : > { %605 = vmatprep.subr.bf16.mxu0 %v688_v0  ;;  %640 = vmatprep.subr.bf16.mxu1 %v688_v0  ;;  %v673_v7 = vld [vmem:[%s731_s20 + $0x8] sm:$0xff]   ;;  %v674_v8 = vld [vmem:[%s731_s20] sm:$0xff]   ;;  %v676_v10 = vld [vmem:[%s740_s24 + $0x18] sm:$0xff]  }
  0x11   : > { %v675_v9 = vld [vmem:[%s740_s24] sm:$0xff]   ;;  %v677_v11 = vld [vmem:[%s740_s24 + $0x8] sm:$0xff]   ;;  %v679_v13 = vld [vmem:[%s740_s24 + $0x10] sm:$0xff]   ;;  %s767_s8 = scalar_lea.vmem %s786_s4, %s656_s5 }
  0x12   : > { %v678_v12 = vld [vmem:[%s740_s24 + $0x20] sm:$0xff]  }
  0x13   : > { %606 = vmatpush3.bf16.msra.mxu0 %v668_v2  ;;  %648 = vmatpush3.bf16.msra.mxu1 %v668_v2  ;;  %v585_v14 = vld [vmem:[%s237_s27] ss:$0 sm:$0xff] }
  0x14   : > { %607 = vmatprep.subr.bf16.mxu0 %v688_v0  ;;  %641 = vmatprep.subr.bf16.mxu1 %v688_v0  ;;  %v586_v16 = vld [vmem:[%s240_s30] ss:$0 sm:$0xff] }
  0x17   : > { %608 = vmatpush3.bf16.msra.mxu0 %v669_v3  ;;  %649 = vmatpush3.bf16.msra.mxu1 %v669_v3 }
  0x18   : > { %609 = vmatprep.subr.bf16.mxu0 %v688_v0  ;;  %642 = vmatprep.subr.bf16.mxu1 %v688_v0 }
  0x1b   : > { %610 = vmatpush3.bf16.msra.mxu0 %v670_v4  ;;  %650 = vmatpush3.bf16.msra.mxu1 %v670_v4 }
  0x1c   : > { %611 = vmatprep.subr.bf16.mxu0 %v688_v0  ;;  %643 = vmatprep.subr.bf16.mxu1 %v688_v0 }
  0x1f   : > { %612 = vmatpush3.bf16.msra.mxu0 %v671_v5  ;;  %651 = vmatpush3.bf16.msra.mxu1 %v671_v5 }
  0x20   : > { %613 = vmatprep.subr.bf16.mxu0 %v688_v0  ;;  %644 = vmatprep.subr.bf16.mxu1 %v688_v0 }
  0x23   : > { %614 = vmatpush3.bf16.msra.mxu0 %v672_v6  ;;  %652 = vmatpush3.bf16.msra.mxu1 %v672_v6 }
  0x24   : > { %615 = vmatprep.subr.bf16.mxu0 %v688_v0  ;;  %645 = vmatprep.subr.bf16.mxu1 %v688_v0 }
  0x27   : > { %616 = vmatpush3.bf16.msra.mxu0 %v673_v7  ;;  %653 = vmatpush3.bf16.msra.mxu1 %v673_v7 }
  0x28   : > { %617 = vmatprep.subr.bf16.mxu0 %v688_v0  ;;  %646 = vmatprep.subr.bf16.mxu1 %v688_v0 }
  0x2b   : > { %618 = vmatpush3.bf16.msra.mxu0 %v674_v8  ;;  %654 = vmatpush3.bf16.msra.mxu1 %v674_v8 }
  0x2e   : > { %620 = vmatmul.mubr.bf16.vlgmr.msra.gmra.mxu0 %v675_v9  ;;  %632 = vmatmul.mubr.bf16.vlgmr.msra.gmra.mxu1 %v676_v10 }
  0x2f   : > { %623 = vmatprep.mubr.msk.bf16.mxu0 %vm689_vm0, %v688_v0  ;;  %635 = vmatprep.mubr.msk.bf16.mxu1 %vm689_vm0, %v688_v0 }
  0x36   : > { %624 = vmatmul.mubr.bf16.gmra.mxu0 %v677_v11  ;;  %636 = vmatmul.mubr.bf16.gmra.mxu1 %v678_v12 }
  0x37   : > { %627 = vmatprep.mubr.msk.bf16.mxu0 %vm689_vm0, %v688_v0 }
  0x3e   : > { %628 = vmatmul.mubr.bf16.gmra.mxu0 %v679_v13 }
  0xee   : > { %v385_v15 = vpop.f32.mrf.mxu0  ;;  %v409_v17 = vpop.f32.mrf.mxu1 }
  0xef   : > { %v431_v18 = vmul.f32 %v585_v14, %v385_v15  ;;  %v437_v19 = vmul.f32 %v585_v14, %v409_v17 }
  0xf0   : > { %v621_v20 = vpop.f32.mrf.mxu0  ;;  %v633_v21 = vpop.f32.mrf.mxu1 }
  0xf1   : > { %v448_v22 = vadd.f32 %v586_v16, %v431_v18  ;;  %v454_v23 = vadd.f32 %v586_v16, %v437_v19 }
  0xf2   : > { %v388_v24 = vpop.f32.mrf.mxu0  ;;  %v412_v25 = vpop.f32.mrf.mxu1 }
  0xf3   : > { %v458_v26 = vmax.f32 %v448_v22, 0.0  ;;  %v464_v27 = vmax.f32 %v454_v23, 0.0  ;;  %v432_v28 = vmul.f32 %v585_v14, %v388_v24  ;;  %v438_v29 = vmul.f32 %v585_v14, %v412_v25 }
  0xf4   : > { %v622_v30 = vpop.f32.mrf.mxu0  ;;  %v634_v31 = vpop.f32.mrf.mxu1 }
  0xf5   : > { %468 = vst [vmem:[%s767_s8] sm:$0xff] %v458_v26  ;;  %474 = vst [vmem:[%s767_s8 + $0x30] sm:$0xff] %v464_v27  ;;  %v449_v32 = vadd.f32 %v586_v16, %v432_v28  ;;  %v455_v33 = vadd.f32 %v586_v16, %v438_v29 }
  0xf6   : > { %v393_v34 = vpop.f32.mrf.mxu0  ;;  %v417_v35 = vpop.f32.mrf.mxu1 }
  0xf7   : > { %v459_v36 = vmax.f32 %v449_v32, 0.0  ;;  %v465_v37 = vmax.f32 %v455_v33, 0.0  ;;  %v433_v38 = vmul.f32 %v585_v14, %v393_v34  ;;  %v439_v39 = vmul.f32 %v585_v14, %v417_v35 }
  0xf8   : > { %v625_v40 = vpop.f32.mrf.mxu0  ;;  %v637_v41 = vpop.f32.mrf.mxu1 }
  0xf9   : > { %469 = vst [vmem:[%s767_s8 + $0x8] sm:$0xff] %v459_v36  ;;  %475 = vst [vmem:[%s767_s8 + $0x38] sm:$0xff] %v465_v37  ;;  %v450_v42 = vadd.f32 %v586_v16, %v433_v38  ;;  %v456_v43 = vadd.f32 %v586_v16, %v439_v39 }
  0xfa   : > { %v396_v44 = vpop.f32.mrf.mxu0  ;;  %v420_v45 = vpop.f32.mrf.mxu1 }
  0xfb   : > { %v460_v46 = vmax.f32 %v450_v42, 0.0  ;;  %v466_v47 = vmax.f32 %v456_v43, 0.0  ;;  %v434_v48 = vmul.f32 %v585_v14, %v396_v44  ;;  %v440_v49 = vmul.f32 %v585_v14, %v420_v45 }
  0xfc   : > { %v626_v50 = vpop.f32.mrf.mxu0  ;;  %v638_v51 = vpop.f32.mrf.mxu1 }
  0xfd   : > { %470 = vst [vmem:[%s767_s8 + $0x10] sm:$0xff] %v460_v46  ;;  %476 = vst [vmem:[%s767_s8 + $0x40] sm:$0xff] %v466_v47  ;;  %v451_v52 = vadd.f32 %v586_v16, %v434_v48  ;;  %v457_v53 = vadd.f32 %v586_v16, %v440_v49 }
  0xfe   : > { %v401_v54 = vpop.f32.mrf.mxu0 }
  0xff   : > { %v461_v55 = vmax.f32 %v451_v52, 0.0  ;;  %v467_v56 = vmax.f32 %v457_v53, 0.0  ;;  %v435_v57 = vmul.f32 %v585_v14, %v401_v54 }
 0x100   : > { %v629_v58 = vpop.f32.mrf.mxu0 }
 0x101   : > { %471 = vst [vmem:[%s767_s8 + $0x18] sm:$0xff] %v461_v55  ;;  %477 = vst [vmem:[%s767_s8 + $0x48] sm:$0xff] %v467_v56  ;;  %v452_v59 = vadd.f32 %v586_v16, %v435_v57 }
 0x102   : > { %v404_v60 = vpop.f32.mrf.mxu0 }
 0x103   : > { %v462_v61 = vmax.f32 %v452_v59, 0.0  ;;  %v436_v62 = vmul.f32 %v585_v14, %v404_v60 }
 0x104   : > { %v630_v63 = vpop.f32.mrf.mxu0 }
 0x105   : > { %472 = vst [vmem:[%s767_s8 + $0x20] sm:$0xff] %v462_v61  ;;  %v453_v0 = vadd.f32 %v586_v16, %v436_v62 }
 0x107   : > { %v463_v1 = vmax.f32 %v453_v0, 0.0 }
 0x109   : > { %473 = vst [vmem:[%s767_s8 + $0x28] sm:$0xff] %v463_v1 }
 0x10a PF: > { %s14_s15 = sadd.s32 1, %s686_s15  }
 0x10b   : > { %p11_p4 = scmp.ge.s32.totalorder %s14_s15, 6  }
 0x10d   :  { %13 = sbr.rel (!%p11_p4) target bundleno = 1 (0x1), region = 75 }

// kernel: _lambda_.3
= control target key start
LH: loop header
LB: loop body
LE: loop exit
PB: predicated region body
PF: predicated region fallthrough
CT: control target
= control target key end

     0   :  { %s4595_s15 = smov 0   ;;  %s4597_s16 = smov 0   ;;  %s5618_s0 = inlined_call_operand.vmem [shape: bf16[2,288,384], index: 0, kind: input, shape index: {}]   ;;  %s5619_s1 = inlined_call_operand.vmem [shape: bf16[1,3,384,128], index: 1, kind: input, shape index: {}]   ;;  %s5620_s2 = inlined_call_operand.vmem [shape: f32[1,128], index: 2, kind: input, shape index: {}]   ;;  %s5621_s3 = inlined_call_operand.vmem [shape: f32[1,128], index: 3, kind: input, shape index: {}]   ;;  %s5622_s4 = inlined_call_operand.vmem [shape: f32[2,256,128], index: 4, kind: output, shape index: {}]  }
   0x1   :  { %s4599_s17 = smov 0  }
   0x2 LB: > { %s33_s18 = sadd.s32 1, %s4564_s16  ;;  %p3445_p0 = scmp.ge.s32.totalorder %s4568_s17, 1  ;;  %s4568_s17 = sphi %s4599_s17, %s14_s17   ;;  %s4564_s16 = sphi %s4597_s16, %s5652_s16   ;;  %s4560_s15 = sphi %s4595_s15, %s5651_s15  }
   0x3   : > { %p35_p1 = scmp.ge.s32.totalorder %s33_s18, 2  ;;  %p221_p2 = scmp.lt.s32.totalorder %s4568_s17, 3 }
   0x5   : > { %s5654_s18 = smov (%p35_p1, %s33_s18), 0  ;;  %p222_p3 = pnand %p3445_p0, %p221_p2 }
   0x7   : > { %225 = sbr.rel (%p222_p3) target bundleno = 537 (0x219), region = 36 }
   0xc   : > { %v4360_v0 = vld [vmem:[%s5619_s1 + $0x78] sm:$0xff]   ;;  %v4362_v2 = vld [vmem:[%s5619_s1 + $0x70] sm:$0xff]   ;;  %p269_p4 = scmp.lt.s32.totalorder %s4560_s15, 1  ;;  %v4364_v4 = vld [vmem:[%s5619_s1 + $0x68] sm:$0xff]  }
   0xd   : > { %v4361_v1 = vld [vmem:[%s5619_s1 + $0x38] sm:$0xff]   ;;  %3766 = vmatprep.subr.bf16.mxu0 %v4360_v0  ;;  %4318 = vmatprep.subr.bf16.mxu1 %v4360_v0  ;;  %v4363_v3 = vld [vmem:[%s5619_s1 + $0x30] sm:$0xff]   ;;  %v4365_v5 = vld [vmem:[%s5619_s1 + $0x28] sm:$0xff]  }
   0xe   : > { %3767 = vmatpush3.bf16.msra.mxu0 %v4361_v1  ;;  %4326 = vmatpush3.bf16.msra.mxu1 %v4361_v1  ;;  %s5656_s15 = smov (!%p269_p4, %s4560_s15), 1  ;;  %v4366_v6 = vld [vmem:[%s5619_s1 + $0x60] sm:$0xff]   ;;  %v4368_v8 = vld [vmem:[%s5619_s1 + $0x58] sm:$0xff]   ;;  %v4370_v10 = vld [vmem:[%s5619_s1 + $0x50] sm:$0xff]  }
   0xf   : > { %3768 = vmatprep.subr.bf16.mxu0 %v4362_v2  ;;  %4319 = vmatprep.subr.bf16.mxu1 %v4362_v2  ;;  %s4334_s7 = smul.u32 432, %s5656_s15  ;;  %v4367_v7 = vld [vmem:[%s5619_s1 + $0x20] sm:$0xff]   ;;  %v4369_v9 = vld [vmem:[%s5619_s1 + $0x18] sm:$0xff]   ;;  %v4371_v13 = vld [vmem:[%s5619_s1 + $0x10] sm:$0xff]   ;;  %s3765_s22 = sshll.u32 %s5656_s15, 8 }
  0x10   : > { %v4372_v14 = vld [vmem:[%s5619_s1 + $0x48] sm:$0xff]   ;;  %v4374_v16 = vld [vmem:[%s5619_s1 + $0x40] sm:$0xff]   ;;  %v4382_v18 = vld [vmem:[%s5619_s1 + $0xb8] sm:$0xff]   ;;  %s5417_s24 = scalar_lea.vmem %s5622_s4, %s3765_s22 }
  0x11   : > { %s4646_s14 = scalar_lea.vmem %s5618_s0, %s4334_s7  ;;  %v4373_v15 = vld [vmem:[%s5619_s1 + $0x8] sm:$0xff]   ;;  %v4375_v17 = vld [vmem:[%s5619_s1] sm:$0xff]   ;;  %v4383_v19 = vld [vmem:[%s5619_s1 + $0x178] sm:$0xff]  }
  0x12   : > { %3769 = vmatpush3.bf16.msra.mxu0 %v4363_v3  ;;  %4327 = vmatpush3.bf16.msra.mxu1 %v4363_v3  ;;  %v4378_v11 = vld [vmem:[%s4646_s14 + $0x4] ss:$12 sps:$4 sm:$0xff]   ;;  %v4376_v20 = vld [vmem:[%s4646_s14] ss:$12 sps:$4 sm:$0xff]   ;;  %v4683_v23 = vld [vmem:[%s4646_s14 + $0x1c] ss:$12 sps:$4 sm:$0xff]  }
  0x13   : > { %3770 = vmatprep.subr.bf16.mxu0 %v4364_v4  ;;  %4320 = vmatprep.subr.bf16.mxu1 %v4364_v4  ;;  %v4381_v12 = vld [vmem:[%s4646_s14 + $0x124] ss:$12 sps:$4 sm:$0xff]   ;;  %v4379_v21 = vld [vmem:[%s4646_s14 + $0x120] ss:$12 sps:$4 sm:$0xff]   ;;  %v4387_v24 = vld [vmem:[%s4646_s14 + $0x13c] ss:$12 sps:$4 sm:$0xff]  }
  0x14   : > { %913 = vmatprep.mubr.bf16.mxu0 %v4378_v11  ;;  %1009 = vmatprep.mubr.bf16.mxu1 %v4381_v12  ;;  %v4384_v22 = vld [vmem:[%s5619_s1 + $0xb0] sm:$0xff]   ;;  %v4391_v26 = vld [vmem:[%s5619_s1 + $0xa8] sm:$0xff]   ;;  %v4697_v28 = vld [vmem:[%s4646_s14 + $0x18] ss:$12 sps:$4 sm:$0xff]  }
  0x15   : > { %v4393_v25 = vld [vmem:[%s5619_s1 + $0x170] sm:$0xff]   ;;  %v4409_v27 = vld [vmem:[%s5619_s1 + $0x168] sm:$0xff]   ;;  %v4390_v29 = vld [vmem:[%s4646_s14 + $0x138] ss:$12 sps:$4 sm:$0xff]  }
  0x16   : > { %3771 = vmatpush3.bf16.msra.mxu0 %v4365_v5  ;;  %4328 = vmatpush3.bf16.msra.mxu1 %v4365_v5  ;;  %v4392_v30 = vld [vmem:[%s5619_s1 + $0xa0] sm:$0xff]   ;;  %v4713_v34 = vld [vmem:[%s4646_s14 + $0x30] ss:$12 sps:$4 sm:$0xff]   ;;  %v4723_v38 = vld [vmem:[%s4646_s14 + $0x4c] ss:$12 sps:$4 sm:$0xff]  }
  0x17   : > { %3772 = vmatprep.subr.bf16.mxu0 %v4366_v6  ;;  %4321 = vmatprep.subr.bf16.mxu1 %v4366_v6  ;;  %v4704_v31 = vld [vmem:[%s4646_s14 + $0x34] ss:$12 sps:$4 sm:$0xff]   ;;  %v4400_v35 = vld [vmem:[%s5619_s1 + $0x98] sm:$0xff]   ;;  %v4408_v42 = vld [vmem:[%s5619_s1 + $0x88] sm:$0xff]  }
  0x18   : > { %v4396_v32 = vld [vmem:[%s4646_s14 + $0x154] ss:$12 sps:$4 sm:$0xff]   ;;  %v4399_v36 = vld [vmem:[%s4646_s14 + $0x150] ss:$12 sps:$4 sm:$0xff]   ;;  %v4404_v39 = vld [vmem:[%s4646_s14 + $0x16c] ss:$12 sps:$4 sm:$0xff]  }
  0x19   : > { %v4418_v33 = vld [vmem:[%s5619_s1 + $0x160] sm:$0xff]   ;;  %v4401_v37 = vld [vmem:[%s5619_s1 + $0x90] sm:$0xff]   ;;  %v4431_v43 = vld [vmem:[%s5619_s1 + $0x158] sm:$0xff]  }
  0x1a   : > { %3773 = vmatpush3.bf16.msra.mxu0 %v4367_v7  ;;  %4329 = vmatpush3.bf16.msra.mxu1 %v4367_v7  ;;  %v4729_v40 = vld [vmem:[%s4646_s14 + $0x48] ss:$12 sps:$4 sm:$0xff]   ;;  %v4410_v44 = vld [vmem:[%s5619_s1 + $0x80] sm:$0xff]   ;;  %v4416_v49 = vld [vmem:[%s5619_s1 + $0x138] sm:$0xff]  }
  0x1b   : > { %3774 = vmatprep.subr.bf16.mxu0 %v4368_v8  ;;  %4322 = vmatprep.subr.bf16.mxu1 %v4368_v8  ;;  %v4407_v41 = vld [vmem:[%s4646_s14 + $0x168] ss:$12 sps:$4 sm:$0xff]   ;;  %v4742_v45 = vld [vmem:[%s4646_s14 + $0x64] ss:$12 sps:$4 sm:$0xff]   ;;  %v4748_v47 = vld [vmem:[%s4646_s14 + $0x60] ss:$12 sps:$4 sm:$0xff]  }
  0x1c   : > { %v4413_v46 = vld [vmem:[%s4646_s14 + $0x8] ss:$12 sps:$4 sm:$0xff]   ;;  %v4415_v48 = vld [vmem:[%s4646_s14 + $0x20] ss:$12 sps:$4 sm:$0xff]   ;;  %v4417_v50 = vld [vmem:[%s5619_s1 + $0xf8] sm:$0xff]  }
  0x1d   : > { %v4441_v51 = vld [vmem:[%s5619_s1 + $0x150] sm:$0xff]   ;;  %v4761_v52 = vld [vmem:[%s4646_s14 + $0x7c] ss:$12 sps:$4 sm:$0xff]   ;;  %v4421_v53 = vld [vmem:[%s4646_s14 + $0x38] ss:$12 sps:$4 sm:$0xff]  }
  0x1e   : > { %3775 = vmatpush3.bf16.msra.mxu0 %v4369_v9  ;;  %4330 = vmatpush3.bf16.msra.mxu1 %v4369_v9  ;;  %v4424_v54 = vld [vmem:[%s5619_s1 + $0x130] sm:$0xff]   ;;  %v4773_v56 = vld [vmem:[%s4646_s14 + $0x78] ss:$12 sps:$4 sm:$0xff]   ;;  %v4432_v57 = vld [vmem:[%s5619_s1 + $0x128] sm:$0xff]  }
  0x1f   : > { %3776 = vmatprep.subr.bf16.mxu0 %v4370_v10  ;;  %4323 = vmatprep.subr.bf16.mxu1 %v4370_v10  ;;  %v4425_v55 = vld [vmem:[%s5619_s1 + $0xf0] sm:$0xff]   ;;  %v4454_v61 = vld [vmem:[%s5619_s1 + $0x148] sm:$0xff]   ;;  %v4439_v63 = vld [vmem:[%s5619_s1 + $0x120] sm:$0xff]  }
  0x20   : > { %v4423_v58 = vld [vmem:[%s4646_s14 + $0x50] ss:$12 sps:$4 sm:$0xff]   ;;  %v4780_v59 = vld [vmem:[%s4646_s14 + $0x94] ss:$12 sps:$4 sm:$0xff]   ;;  %v4433_v62 = vld [vmem:[%s5619_s1 + $0xe8] sm:$0xff]  }
  0x21   : > { %v4428_v60 = vld [vmem:[%s4646_s14 + $0x68] ss:$12 sps:$4 sm:$0xff]   ;;  %v4795_v0 = vld [vmem:[%s4646_s14 + $0x90] ss:$12 sps:$4 sm:$0xff]   ;;  %v4430_v1 = vld [vmem:[%s4646_s14 + $0x80] ss:$12 sps:$4 sm:$0xff]  }
  0x22   : > { %3777 = vmatpush3.bf16.msra.mxu0 %v4371_v13  ;;  %4331 = vmatpush3.bf16.msra.mxu1 %v4371_v13  ;;  %v4440_v2 = vld [vmem:[%s5619_s1 + $0xe0] sm:$0xff]   ;;  %v4802_v3 = vld [vmem:[%s4646_s14 + $0xac] ss:$12 sps:$4 sm:$0xff]   ;;  %v4455_v8 = vld [vmem:[%s5619_s1 + $0x110] sm:$0xff]  }
  0x23   : > { %3778 = vmatprep.subr.bf16.mxu0 %v4372_v14  ;;  %4324 = vmatprep.subr.bf16.mxu1 %v4372_v14  ;;  %v4447_v4 = vld [vmem:[%s5619_s1 + $0x118] sm:$0xff]   ;;  %v4464_v6 = vld [vmem:[%s5619_s1 + $0x140] sm:$0xff]   ;;  %v4820_v9 = vld [vmem:[%s4646_s14 + $0xa8] ss:$12 sps:$4 sm:$0xff]  }
  0x24   : > { %v4436_v5 = vld [vmem:[%s4646_s14 + $0x98] ss:$12 sps:$4 sm:$0xff]   ;;  %v4438_v10 = vld [vmem:[%s4646_s14 + $0xb0] ss:$12 sps:$4 sm:$0xff]   ;;  %v4462_v13 = vld [vmem:[%s5619_s1 + $0x108] sm:$0xff]  }
  0x25   : > { %v4448_v7 = vld [vmem:[%s5619_s1 + $0xd8] sm:$0xff]   ;;  %v4456_v11 = vld [vmem:[%s5619_s1 + $0xd0] sm:$0xff]  }
  0x26   : > { %3779 = vmatpush3.bf16.msra.mxu0 %v4373_v15  ;;  %4332 = vmatpush3.bf16.msra.mxu1 %v4373_v15  ;;  %v4827_v12 = vld [vmem:[%s4646_s14 + $0xc4] ss:$12 sps:$4 sm:$0xff]   ;;  %v4444_v14 = vld [vmem:[%s4646_s14 + $0xc8] ss:$12 sps:$4 sm:$0xff]  }
  0x27   : > { %3780 = vmatprep.subr.bf16.mxu0 %v4374_v16  ;;  %4325 = vmatprep.subr.bf16.mxu1 %v4374_v16  ;;  %v4463_v15 = vld [vmem:[%s5619_s1 + $0xc8] sm:$0xff]   ;;  %v4474_v16 = vld [vmem:[%s5619_s1 + $0x1f8] sm:$0xff]  }
  0x2a   : > { %3781 = vmatpush3.bf16.msra.mxu0 %v4375_v17  ;;  %4333 = vmatpush3.bf16.msra.mxu1 %v4375_v17  ;;  %v4470_v17 = vld [vmem:[%s5619_s1 + $0x100] sm:$0xff]  }
  0x2b   : > { %4174 = vmatprep.subr.bf16.mxu1 %v4382_v18  ;;  %4222 = vmatprep.subr.bf16.mxu0 %v4383_v19 }
  0x2d   : > { %914 = vmatmul.mubr.bf16.vlgmr.msra.gmra.mxu0 %v4376_v20  ;;  %1010 = vmatmul.mubr.bf16.vlgmr.msra.gmra.mxu1 %v4379_v21  ;;  %v4471_v20 = vld [vmem:[%s5619_s1 + $0xc0] sm:$0xff]   ;;  %v4476_v21 = vld [vmem:[%s5619_s1 + $0x238] sm:$0xff]  }
  0x2e   : > { %4175 = vmatpush3.bf16.msra.mxu1 %v4382_v18  ;;  %4223 = vmatpush3.bf16.msra.mxu0 %v4383_v19  ;;  %v4845_v18 = vld [vmem:[%s4646_s14 + $0xc0] ss:$12 sps:$4 sm:$0xff]  }
  0x2f   : > { %4176 = vmatprep.subr.bf16.mxu1 %v4384_v22  ;;  %921 = vmatprep.mubr.bf16.mxu0 %v4683_v23  ;;  %v4446_v19 = vld [vmem:[%s4646_s14 + $0xe0] ss:$12 sps:$4 sm:$0xff]  }
  0x30   : > { %1017 = vmatprep.mubr.bf16.mxu1 %v4387_v24  ;;  %4224 = vmatprep.subr.bf16.mxu0 %v4393_v25  ;;  %v4451_v24 = vld [vmem:[%s4646_s14 + $0xf8] ss:$12 sps:$4 sm:$0xff]  }
  0x32   : > { %4177 = vmatpush3.bf16.msra.mxu1 %v4384_v22  ;;  %4225 = vmatpush3.bf16.msra.mxu0 %v4393_v25  ;;  %v4855_v22 = vld [vmem:[%s4646_s14 + $0xdc] ss:$12 sps:$4 sm:$0xff]   ;;  %v4861_v25 = vld [vmem:[%s4646_s14 + $0xd8] ss:$12 sps:$4 sm:$0xff]  }
  0x33   : > { %4178 = vmatprep.subr.bf16.mxu1 %v4391_v26  ;;  %4226 = vmatprep.subr.bf16.mxu0 %v4409_v27 }
  0x35   : > { %922 = vmatmul.mubr.bf16.gmra.mxu0 %v4697_v28  ;;  %1018 = vmatmul.mubr.bf16.gmra.mxu1 %v4390_v29  ;;  %v4459_v29 = vld [vmem:[%s4646_s14 + $0x128] ss:$12 sps:$4 sm:$0xff]  }
  0x36   : > { %4179 = vmatpush3.bf16.msra.mxu1 %v4391_v26  ;;  %929 = vmatprep.mubr.bf16.mxu0 %v4704_v31  ;;  %v4453_v26 = vld [vmem:[%s4646_s14 + $0x110] ss:$12 sps:$4 sm:$0xff]  }
  0x37   : > { %4180 = vmatprep.subr.bf16.mxu1 %v4392_v30  ;;  %1025 = vmatprep.mubr.bf16.mxu1 %v4396_v32  ;;  %v4461_v32 = vld [vmem:[%s4646_s14 + $0x140] ss:$12 sps:$4 sm:$0xff]  }
  0x38   : > { %4227 = vmatpush3.bf16.msra.mxu0 %v4409_v27  ;;  %v4865_v27 = vld [vmem:[%s4646_s14 + $0xf4] ss:$12 sps:$4 sm:$0xff]  }
  0x39   : > { %4228 = vmatprep.subr.bf16.mxu0 %v4418_v33 }
  0x3a   : > { %4181 = vmatpush3.bf16.msra.mxu1 %v4392_v30  ;;  %v4871_v30 = vld [vmem:[%s4646_s14 + $0xf0] ss:$12 sps:$4 sm:$0xff]  }
  0x3b   : > { %4182 = vmatprep.subr.bf16.mxu1 %v4400_v35 }
  0x3c   : > { %4229 = vmatpush3.bf16.msra.mxu0 %v4418_v33  ;;  %v4875_v33 = vld [vmem:[%s4646_s14 + $0x10c] ss:$12 sps:$4 sm:$0xff]  }
  0x3d   : > { %930 = vmatmul.mubr.bf16.gmra.mxu0 %v4713_v34  ;;  %1026 = vmatmul.mubr.bf16.gmra.mxu1 %v4399_v36  ;;  %v4881_v36 = vld [vmem:[%s4646_s14 + $0x108] ss:$12 sps:$4 sm:$0xff]  }
  0x3e   : > { %4183 = vmatpush3.bf16.msra.mxu1 %v4400_v35  ;;  %937 = vmatprep.mubr.bf16.mxu0 %v4723_v38  ;;  %v4467_v35 = vld [vmem:[%s4646_s14 + $0x158] ss:$12 sps:$4 sm:$0xff]  }
  0x3f   : > { %4184 = vmatprep.subr.bf16.mxu1 %v4401_v37  ;;  %1033 = vmatprep.mubr.bf16.mxu1 %v4404_v39  ;;  %v4472_v39 = vld [vmem:[%s4646_s14 + $0x20] ss:$12 sps:$4 sm:$0xff]  }
  0x40   : > { %4230 = vmatprep.subr.bf16.mxu0 %v4431_v43 }
  0x41   : > { %4231 = vmatpush3.bf16.msra.mxu0 %v4431_v43  ;;  %v4477_v43 = vld [vmem:[%s4646_s14 + $0x50] ss:$12 sps:$4 sm:$0xff]  }
  0x42   : > { %4185 = vmatpush3.bf16.msra.mxu1 %v4401_v37  ;;  %4232 = vmatprep.subr.bf16.mxu0 %v4441_v51  ;;  %v4469_v37 = vld [vmem:[%s4646_s14 + $0x170] ss:$12 sps:$4 sm:$0xff]  }
  0x43   : > { %4186 = vmatprep.subr.bf16.mxu1 %v4408_v42 }
  0x45   : > { %938 = vmatmul.mubr.bf16.gmra.mxu0 %v4729_v40  ;;  %1034 = vmatmul.mubr.bf16.gmra.mxu1 %v4407_v41  ;;  %v4473_v41 = vld [vmem:[%s4646_s14 + $0x38] ss:$12 sps:$4 sm:$0xff]  }
  0x46   : > { %4187 = vmatpush3.bf16.msra.mxu1 %v4408_v42  ;;  %945 = vmatprep.mubr.bf16.mxu0 %v4742_v45  ;;  %v4475_v42 = vld [vmem:[%s5619_s1 + $0x1b8] sm:$0xff]  }
  0x47   : > { %4188 = vmatprep.subr.bf16.mxu1 %v4410_v44  ;;  %4190 = vmatprep.mubr.bf16.mxu1 %v4413_v46  ;;  %v4485_v46 = vld [vmem:[%s5619_s1 + $0x230] sm:$0xff]  }
  0x48   : > { %4233 = vmatpush3.bf16.msra.mxu0 %v4441_v51  ;;  %v4484_v51 = vld [vmem:[%s5619_s1 + $0x1a8] sm:$0xff]  }
  0x49   : > { %4234 = vmatprep.subr.bf16.mxu0 %v4454_v61 }
  0x4a   : > { %4189 = vmatpush3.bf16.msra.mxu1 %v4410_v44  ;;  %v4479_v44 = vld [vmem:[%s5619_s1 + $0x1f0] sm:$0xff]  }
  0x4b   : > { %3902 = vmatprep.subr.bf16.mxu1 %v4416_v49  ;;  %v4478_v49 = vld [vmem:[%s4646_s14 + $0x68] ss:$12 sps:$4 sm:$0xff]  }
  0x4c   : > { %4235 = vmatpush3.bf16.msra.mxu0 %v4454_v61  ;;  %v4486_v61 = vld [vmem:[%s4646_s14 + $0xb0] ss:$12 sps:$4 sm:$0xff]  }
  0x4d   : > { %946 = vmatmul.mubr.bf16.gmra.mxu0 %v4748_v47  ;;  %4191 = vmatmul.mubr.bf16.vlgmr.msra.gmra.mxu1 %v4415_v48  ;;  %v4483_v48 = vld [vmem:[%s5619_s1 + $0x1e8] sm:$0xff]  }
  0x4e   : > { %3903 = vmatpush3.bf16.msra.mxu1 %v4417_v50  ;;  %953 = vmatprep.mubr.bf16.mxu0 %v4761_v52  ;;  %v4494_v50 = vld [vmem:[%s5619_s1 + $0x228] sm:$0xff]  }
  0x4f   : > { %4194 = vmatprep.mubr.bf16.mxu1 %v4421_v53  ;;  %3904 = vmatprep.subr.bf16.mxu1 %v4424_v54  ;;  %v4488_v53 = vld [vmem:[%s5619_s1 + $0x1e0] sm:$0xff]  }
  0x50   : > { %4236 = vmatprep.subr.bf16.mxu0 %v4464_v6  ;;  %v4503_v54 = vld [vmem:[%s5619_s1 + $0x220] sm:$0xff]  }
  0x51   : > { %4237 = vmatpush3.bf16.msra.mxu0 %v4464_v6  ;;  %v4487_v6 = vld [vmem:[%s4646_s14 + $0xc8] ss:$12 sps:$4 sm:$0xff]  }
  0x52   : > { %3905 = vmatpush3.bf16.msra.mxu1 %v4425_v55  ;;  %4038 = vmatprep.subr.bf16.mxu0 %v4474_v16  ;;  %v4489_v55 = vld [vmem:[%s5619_s1 + $0x1a0] sm:$0xff]   ;;  %v4496_v16 = vld [vmem:[%s4646_s14 + $0x128] ss:$12 sps:$4 sm:$0xff]  }
  0x53   : > { %3906 = vmatprep.subr.bf16.mxu1 %v4432_v57  ;;  %v4492_v57 = vld [vmem:[%s5619_s1 + $0x1d8] sm:$0xff]  }
  0x55   : > { %954 = vmatmul.mubr.bf16.gmra.mxu0 %v4773_v56  ;;  %4195 = vmatmul.mubr.bf16.gmra.mxu1 %v4423_v58  ;;  %v4508_v58 = vld [vmem:[%s5619_s1 + $0x218] sm:$0xff]  }
  0x56   : > { %961 = vmatprep.mubr.bf16.mxu0 %v4780_v59  ;;  %4198 = vmatprep.mubr.bf16.mxu1 %v4428_v60  ;;  %v4482_v60 = vld [vmem:[%s4646_s14 + $0x98] ss:$12 sps:$4 sm:$0xff]  }
  0x57   : > { %3907 = vmatpush3.bf16.msra.mxu1 %v4433_v62  ;;  %v4493_v62 = vld [vmem:[%s5619_s1 + $0x198] sm:$0xff]  }
  0x58   : > { %3908 = vmatprep.subr.bf16.mxu1 %v4439_v63  ;;  %v4497_v63 = vld [vmem:[%s5619_s1 + $0x1d0] sm:$0xff]  }
  0x5b   : > { %3909 = vmatpush3.bf16.msra.mxu1 %v4440_v2  ;;  %v4498_v2 = vld [vmem:[%s5619_s1 + $0x190] sm:$0xff]  }
  0x5c   : > { %3910 = vmatprep.subr.bf16.mxu1 %v4447_v4  ;;  %v4501_v4 = vld [vmem:[%s5619_s1 + $0x1c8] sm:$0xff]  }
  0x5d   : > { %962 = vmatmul.mubr.bf16.gmra.mxu0 %v4795_v0  ;;  %4199 = vmatmul.mubr.bf16.gmra.mxu1 %v4430_v1  ;;  %v4509_v1 = vld [vmem:[%s5619_s1 + $0x210] sm:$0xff]  }
  0x5e   : > { %969 = vmatprep.mubr.bf16.mxu0 %v4802_v3  ;;  %4202 = vmatprep.mubr.bf16.mxu1 %v4436_v5  ;;  %v4516_v5 = vld [vmem:[%s5619_s1 + $0x208] sm:$0xff]  }
  0x5f   : > { %3911 = vmatpush3.bf16.msra.mxu1 %v4448_v7  ;;  %v4490_v7 = vld [vmem:[%s4646_s14 + $0xe0] ss:$12 sps:$4 sm:$0xff]  }
  0x60   : > { %3912 = vmatprep.subr.bf16.mxu1 %v4455_v8  ;;  %v4502_v8 = vld [vmem:[%s5619_s1 + $0x188] sm:$0xff]  }
  0x63   : > { %3913 = vmatpush3.bf16.msra.mxu1 %v4456_v11  ;;  %v4523_v11 = vld [vmem:[%s5619_s1 + $0x200] sm:$0xff]  }
  0x64   : > { %3914 = vmatprep.subr.bf16.mxu1 %v4462_v13  ;;  %v4507_v13 = vld [vmem:[%s5619_s1 + $0x180] sm:$0xff]  }
  0x65   : > { %970 = vmatmul.mubr.bf16.gmra.mxu0 %v4820_v9  ;;  %4203 = vmatmul.mubr.bf16.gmra.mxu1 %v4438_v10  ;;  %v4506_v10 = vld [vmem:[%s5619_s1 + $0x1c0] sm:$0xff]  }
  0x66   : > { %977 = vmatprep.mubr.bf16.mxu0 %v4827_v12  ;;  %4206 = vmatprep.mubr.bf16.mxu1 %v4444_v14  ;;  %v4491_v14 = vld [vmem:[%s4646_s14 + $0xf8] ss:$12 sps:$4 sm:$0xff]  }
  0x67   : > { %3915 = vmatpush3.bf16.msra.mxu1 %v4463_v15  ;;  %v4495_v15 = vld [vmem:[%s4646_s14 + $0x110] ss:$12 sps:$4 sm:$0xff]  }
  0x68   : > { %3916 = vmatprep.subr.bf16.mxu1 %v4470_v17  ;;  %v4499_v17 = vld [vmem:[%s4646_s14 + $0x140] ss:$12 sps:$4 sm:$0xff]  }
  0x6b   : > { %3917 = vmatpush3.bf16.msra.mxu1 %v4471_v20  ;;  %v4504_v20 = vld [vmem:[%s4646_s14 + $0x170] ss:$12 sps:$4 sm:$0xff]  }
  0x6c   : > { %4270 = vmatprep.subr.bf16.mxu1 %v4476_v21 }
  0x6d   : > { %978 = vmatmul.mubr.bf16.gmra.mxu0 %v4845_v18  ;;  %4207 = vmatmul.mubr.bf16.gmra.mxu1 %v4446_v19  ;;  %v4500_v19 = vld [vmem:[%s4646_s14 + $0x158] ss:$12 sps:$4 sm:$0xff]  }
  0x6e   : > { %985 = vmatprep.mubr.bf16.mxu0 %v4855_v22  ;;  %4210 = vmatprep.mubr.bf16.mxu1 %v4451_v24  ;;  %v4994_v24 = vld [vmem:[%s4646_s14 + $0x124] ss:$12 sps:$4 sm:$0xff]  }
  0x75   : > { %986 = vmatmul.mubr.bf16.gmra.mxu0 %v4861_v25  ;;  %4211 = vmatmul.mubr.bf16.gmra.mxu1 %v4453_v26 }
  0x76   : > { %993 = vmatprep.mubr.bf16.mxu0 %v4865_v27  ;;  %4214 = vmatprep.mubr.bf16.mxu1 %v4459_v29 }
  0x7d   : > { %994 = vmatmul.mubr.bf16.gmra.mxu0 %v4871_v30  ;;  %4215 = vmatmul.mubr.bf16.gmra.mxu1 %v4461_v32 }
  0x7e   : > { %1001 = vmatprep.mubr.bf16.mxu0 %v4875_v33  ;;  %4218 = vmatprep.mubr.bf16.mxu1 %v4467_v35  ;;  %v5025_v35 = vld [vmem:[%s4646_s14 + $0x150] ss:$12 sps:$4 sm:$0xff]  }
  0x85   : > { %1002 = vmatmul.mubr.bf16.gmra.mxu0 %v4881_v36  ;;  %4219 = vmatmul.mubr.bf16.gmra.mxu1 %v4469_v37  ;;  %v5028_v37 = vld [vmem:[%s4646_s14 + $0x16c] ss:$12 sps:$4 sm:$0xff]  }
  0x86   : > { %1844 = vmatprep.mubr.bf16.mxu1 %v4683_v23  ;;  %4238 = vmatprep.mubr.bf16.mxu0 %v4472_v39  ;;  %v4480_v23 = vld [vmem:[%s5619_s1 + $0x1b0] sm:$0xff]  }
  0x8d   : > { %1845 = vmatmul.mubr.bf16.vlgmr.msra.gmra.mxu1 %v4697_v28  ;;  %4239 = vmatmul.mubr.bf16.vlgmr.msra.gmra.mxu0 %v4473_v41  ;;  %v4481_v28 = vld [vmem:[%s4646_s14 + $0x80] ss:$12 sps:$4 sm:$0xff]  }
  0x8e   : > { %4039 = vmatpush3.bf16.msra.mxu0 %v4475_v42  ;;  %4271 = vmatpush3.bf16.msra.mxu1 %v4476_v21  ;;  %v4505_v21 = vld [vmem:[%s4646_s14 + $0x188] ss:$12 sps:$4 sm:$0xff]  }
  0x8f   : > { %1852 = vmatprep.mubr.bf16.mxu1 %v4704_v31  ;;  %4242 = vmatprep.mubr.bf16.mxu0 %v4477_v43 }
  0x90   : > { %4040 = vmatprep.subr.bf16.mxu0 %v4479_v44  ;;  %4272 = vmatprep.subr.bf16.mxu1 %v4485_v46 }
  0x92   : > { %4041 = vmatpush3.bf16.msra.mxu0 %v4480_v23  ;;  %4273 = vmatpush3.bf16.msra.mxu1 %v4485_v46 }
  0x93   : > { %4042 = vmatprep.subr.bf16.mxu0 %v4483_v48  ;;  %4274 = vmatprep.subr.bf16.mxu1 %v4494_v50 }
  0x95   : > { %1853 = vmatmul.mubr.bf16.gmra.mxu1 %v4713_v34  ;;  %4243 = vmatmul.mubr.bf16.gmra.mxu0 %v4478_v49 }
  0x96   : > { %1860 = vmatprep.mubr.bf16.mxu1 %v4723_v38  ;;  %4246 = vmatprep.mubr.bf16.mxu0 %v4481_v28  ;;  %v5041_v28 = vld [vmem:[%s4646_s14 + $0x168] ss:$12 sps:$4 sm:$0xff]  }
  0x97   : > { %4043 = vmatpush3.bf16.msra.mxu0 %v4484_v51  ;;  %4275 = vmatpush3.bf16.msra.mxu1 %v4494_v50  ;;  %v5044_v51 = vld [vmem:[%s4646_s14 + $0x184] ss:$12 sps:$4 sm:$0xff]  }
  0x98   : > { %4044 = vmatprep.subr.bf16.mxu0 %v4488_v53  ;;  %4276 = vmatprep.subr.bf16.mxu1 %v4503_v54 }
  0x9b   : > { %4045 = vmatpush3.bf16.msra.mxu0 %v4489_v55  ;;  %4277 = vmatpush3.bf16.msra.mxu1 %v4503_v54 }
  0x9c   : > { %4046 = vmatprep.subr.bf16.mxu0 %v4492_v57  ;;  %4278 = vmatprep.subr.bf16.mxu1 %v4508_v58 }
  0x9d   : > { %1861 = vmatmul.mubr.bf16.gmra.mxu1 %v4729_v40  ;;  %4247 = vmatmul.mubr.bf16.gmra.mxu0 %v4482_v60 }
  0x9e   : > { %1868 = vmatprep.mubr.bf16.mxu1 %v4742_v45  ;;  %4250 = vmatprep.mubr.bf16.mxu0 %v4486_v61 }
  0x9f   : > { %4047 = vmatpush3.bf16.msra.mxu0 %v4493_v62  ;;  %4279 = vmatpush3.bf16.msra.mxu1 %v4508_v58 }
  0xa0   : > { %4048 = vmatprep.subr.bf16.mxu0 %v4497_v63  ;;  %4280 = vmatprep.subr.bf16.mxu1 %v4509_v1 }
  0xa3   : > { %4049 = vmatpush3.bf16.msra.mxu0 %v4498_v2  ;;  %4281 = vmatpush3.bf16.msra.mxu1 %v4509_v1  ;;  %v5055_v2 = vld [vmem:[%s4646_s14 + $0x180] ss:$12 sps:$4 sm:$0xff]  }
  0xa4   : > { %4050 = vmatprep.subr.bf16.mxu0 %v4501_v4  ;;  %4282 = vmatprep.subr.bf16.mxu1 %v4516_v5  ;;  %v4527_v4 = vld [vmem:[%s4646_s14 + $0x38] ss:$12 sps:$4 sm:$0xff]  }
  0xa5   : > { %1869 = vmatmul.mubr.bf16.gmra.mxu1 %v4748_v47  ;;  %4251 = vmatmul.mubr.bf16.gmra.mxu0 %v4487_v6 }
  0xa6   : > { %1876 = vmatprep.mubr.bf16.mxu1 %v4761_v52  ;;  %4254 = vmatprep.mubr.bf16.mxu0 %v4490_v7 }
  0xa7   : > { %4051 = vmatpush3.bf16.msra.mxu0 %v4502_v8  ;;  %4283 = vmatpush3.bf16.msra.mxu1 %v4516_v5 }
  0xa8   : > { %4052 = vmatprep.subr.bf16.mxu0 %v4506_v10  ;;  %4284 = vmatprep.subr.bf16.mxu1 %v4523_v11 }
  0xab   : > { %4053 = vmatpush3.bf16.msra.mxu0 %v4507_v13  ;;  %4285 = vmatpush3.bf16.msra.mxu1 %v4523_v11 }
  0xad   : > { %1877 = vmatmul.mubr.bf16.gmra.mxu1 %v4773_v56  ;;  %4255 = vmatmul.mubr.bf16.gmra.mxu0 %v4491_v14 }
  0xae   : > { %1884 = vmatprep.mubr.bf16.mxu1 %v4780_v59  ;;  %4258 = vmatprep.mubr.bf16.mxu0 %v4495_v15 }
  0xb5   : > { %1885 = vmatmul.mubr.bf16.gmra.mxu1 %v4795_v0  ;;  %4259 = vmatmul.mubr.bf16.gmra.mxu0 %v4496_v16 }
  0xb6   : > { %1892 = vmatprep.mubr.bf16.mxu1 %v4802_v3  ;;  %4262 = vmatprep.mubr.bf16.mxu0 %v4499_v17  ;;  %v4528_v17 = vld [vmem:[%s4646_s14 + $0x50] ss:$12 sps:$4 sm:$0xff]  }
  0xbd   : > { %1893 = vmatmul.mubr.bf16.gmra.mxu1 %v4820_v9  ;;  %4263 = vmatmul.mubr.bf16.gmra.mxu0 %v4500_v19  ;;  %v4529_v19 = vld [vmem:[%s4646_s14 + $0x68] ss:$12 sps:$4 sm:$0xff]  }
  0xbe   : > { %1900 = vmatprep.mubr.bf16.mxu1 %v4827_v12  ;;  %4266 = vmatprep.mubr.bf16.mxu0 %v4504_v20 }
  0xc5   : > { %1901 = vmatmul.mubr.bf16.gmra.mxu1 %v4845_v18  ;;  %4267 = vmatmul.mubr.bf16.gmra.mxu0 %v4505_v21 }
  0xc6   : > { %1908 = vmatprep.mubr.bf16.mxu1 %v4855_v22  ;;  %2775 = vmatprep.mubr.bf16.mxu0 %v4704_v31  ;;  %v5001_v31 = vld [vmem:[%s4646_s14 + $0x120] ss:$12 sps:$4 sm:$0xff]  }
  0xcd   : > { %1909 = vmatmul.mubr.bf16.gmra.mxu1 %v4861_v25  ;;  %2776 = vmatmul.mubr.bf16.vlgmr.msra.gmra.mxu0 %v4713_v34  ;;  %v5004_v34 = vld [vmem:[%s4646_s14 + $0x13c] ss:$12 sps:$4 sm:$0xff]  }
  0xce   : > { %1916 = vmatprep.mubr.bf16.mxu1 %v4865_v27  ;;  %2783 = vmatprep.mubr.bf16.mxu0 %v4723_v38  ;;  %v5011_v38 = vld [vmem:[%s4646_s14 + $0x138] ss:$12 sps:$4 sm:$0xff]  }
  0xd5   : > { %1917 = vmatmul.mubr.bf16.gmra.mxu1 %v4871_v30  ;;  %2784 = vmatmul.mubr.bf16.gmra.mxu0 %v4729_v40  ;;  %v5014_v40 = vld [vmem:[%s4646_s14 + $0x154] ss:$12 sps:$4 sm:$0xff]  }
  0xd6   : > { %1924 = vmatprep.mubr.bf16.mxu1 %v4875_v33  ;;  %2791 = vmatprep.mubr.bf16.mxu0 %v4742_v45 }
  0xdd   : > { %1925 = vmatmul.mubr.bf16.gmra.mxu1 %v4881_v36  ;;  %2792 = vmatmul.mubr.bf16.gmra.mxu0 %v4748_v47 }
  0xde   : > { %1932 = vmatprep.mubr.bf16.mxu1 %v4994_v24  ;;  %2799 = vmatprep.mubr.bf16.mxu0 %v4761_v52 }
  0xe5   : > { %1933 = vmatmul.mubr.bf16.gmra.mxu1 %v5001_v31  ;;  %2800 = vmatmul.mubr.bf16.gmra.mxu0 %v4773_v56 }
  0xe6   : > { %1940 = vmatprep.mubr.bf16.mxu1 %v5004_v34  ;;  %2807 = vmatprep.mubr.bf16.mxu0 %v4780_v59 }
  0xed   : > { %v3782_v45 = vpop.f32.mrf.mxu0  ;;  %v3854_v47 = vpop.f32.mrf.mxu1  ;;  %1941 = vmatmul.mubr.bf16.gmra.mxu1 %v5011_v38  ;;  %2808 = vmatmul.mubr.bf16.gmra.mxu0 %v4795_v0 }
  0xee   : > { %1948 = vmatprep.mubr.bf16.mxu1 %v5014_v40  ;;  %2815 = vmatprep.mubr.bf16.mxu0 %v4802_v3 }
  0xef   : > { %v3783_v52 = vpop.f32.mrf.mxu0  ;;  %v3855_v56 = vpop.f32.mrf.mxu1 }
  0xf0   : > { %v5020_v26 = vadd.f32 %v3783_v52, %v3782_v45  ;;  %v5022_v59 = vadd.f32 %v3855_v56, %v3854_v47 }
  0xf1   : > { %v3785_v29 = vpop.f32.mrf.mxu0  ;;  %v3857_v32 = vpop.f32.mrf.mxu1 }
  0xf3   : > { %v3786_v39 = vpop.f32.mrf.mxu0  ;;  %v3858_v41 = vpop.f32.mrf.mxu1 }
  0xf4   : > { %v5030_v0 = vadd.f32 %v3786_v39, %v3785_v29  ;;  %v5032_v42 = vadd.f32 %v3858_v41, %v3857_v32 }
  0xf5   : > { %v3788_v3 = vpop.f32.mrf.mxu0  ;;  %v3860_v43 = vpop.f32.mrf.mxu1  ;;  %1949 = vmatmul.mubr.bf16.gmra.mxu1 %v5025_v35  ;;  %2816 = vmatmul.mubr.bf16.gmra.mxu0 %v4820_v9 }
  0xf6   : > { %1956 = vmatprep.mubr.bf16.mxu1 %v5028_v37  ;;  %2823 = vmatprep.mubr.bf16.mxu0 %v4827_v12 }
  0xf7   : > { %v3789_v44 = vpop.f32.mrf.mxu0  ;;  %v3861_v46 = vpop.f32.mrf.mxu1 }
  0xf8   : > { %v3790_v23 = vadd.f32 %v3789_v44, %v3788_v3  ;;  %v5038_v48 = vadd.f32 %v3861_v46, %v3860_v43  ;;  %v4530_v43 = vld [vmem:[%s4646_s14 + $0x80] ss:$12 sps:$4 sm:$0xff]   ;;  %v4531_v46 = vld [vmem:[%s4646_s14 + $0x98] ss:$12 sps:$4 sm:$0xff]  }
  0xf9   : > { %v3791_v49 = vpop.f32.mrf.mxu0  ;;  %v3863_v50 = vpop.f32.mrf.mxu1 }
  0xfb   : > { %v3792_v53 = vpop.f32.mrf.mxu0  ;;  %v3864_v54 = vpop.f32.mrf.mxu1 }
  0xfc   : > { %v3793_v9 = vadd.f32 %v3792_v53, %v3791_v49  ;;  %v5046_v55 = vadd.f32 %v3864_v54, %v3863_v50 }
  0xfd   : > { %v3794_v57 = vpop.f32.mrf.mxu0  ;;  %v3866_v12 = vpop.f32.mrf.mxu1  ;;  %1957 = vmatmul.mubr.bf16.gmra.mxu1 %v5041_v28  ;;  %2824 = vmatmul.mubr.bf16.gmra.mxu0 %v4845_v18 }
  0xfe   : > { %1964 = vmatprep.mubr.bf16.mxu1 %v5044_v51  ;;  %2831 = vmatprep.mubr.bf16.mxu0 %v4855_v22 }
  0xff   : > { %v3795_v58 = vpop.f32.mrf.mxu0  ;;  %v3867_v60 = vpop.f32.mrf.mxu1 }
 0x100   : > { %v3796_v61 = vadd.f32 %v3795_v58, %v3794_v57  ;;  %v5052_v62 = vadd.f32 %v3867_v60, %v3866_v12 }
 0x101   : > { %v3797_v63 = vpop.f32.mrf.mxu0  ;;  %v3869_v1 = vpop.f32.mrf.mxu1 }
 0x103   : > { %v3798_v5 = vpop.f32.mrf.mxu0  ;;  %v3870_v6 = vpop.f32.mrf.mxu1 }
 0x104   : > { %v3799_v7 = vadd.f32 %v3798_v5, %v3797_v63  ;;  %v5058_v18 = vadd.f32 %v3870_v6, %v3869_v1  ;;  %v4533_v1 = vld [vmem:[%s4646_s14 + $0xc8] ss:$12 sps:$4 sm:$0xff]  }
 0x105   : > { %v3800_v8 = vpop.f32.mrf.mxu0  ;;  %v3872_v10 = vpop.f32.mrf.mxu1  ;;  %1965 = vmatmul.mubr.bf16.gmra.mxu1 %v5055_v2  ;;  %2832 = vmatmul.mubr.bf16.gmra.mxu0 %v4861_v25 }
 0x106   : > { %2839 = vmatprep.mubr.bf16.mxu0 %v4865_v27  ;;  %4286 = vmatprep.mubr.bf16.mxu1 %v4527_v4 }
 0x107   : > { %v3801_v22 = vpop.f32.mrf.mxu0  ;;  %v3873_v11 = vpop.f32.mrf.mxu1 }
 0x108   : > { %v3802_v13 = vadd.f32 %v3801_v22, %v3800_v8  ;;  %v5063_v14 = vadd.f32 %v3873_v11, %v3872_v10 }
 0x109   : > { %v3803_v15 = vpop.f32.mrf.mxu0  ;;  %v3875_v16 = vpop.f32.mrf.mxu1 }
 0x10b   : > { %v3804_v20 = vpop.f32.mrf.mxu0  ;;  %v3876_v21 = vpop.f32.mrf.mxu1 }
 0x10c   : > { %v3805_v45 = vadd.f32 %v3804_v20, %v3803_v15  ;;  %v5067_v47 = vadd.f32 %v3876_v21, %v3875_v16 }
 0x10d   : > { %v3806_v25 = vpop.f32.mrf.mxu0  ;;  %v4192_v52 = vpop.f32.mrf.mxu1  ;;  %2840 = vmatmul.mubr.bf16.gmra.mxu0 %v4871_v30  ;;  %4287 = vmatmul.mubr.bf16.vlgmr.msra.gmra.mxu1 %v4528_v17 }
 0x10e   : > { %v5070_v27 = vadd.f32 %v4192_v52, %v3790_v23  ;;  %2847 = vmatprep.mubr.bf16.mxu0 %v4875_v33  ;;  %4290 = vmatprep.mubr.bf16.mxu1 %v4529_v19  ;;  %v4535_v19 = vld [vmem:[%s4646_s14 + $0xf8] ss:$12 sps:$4 sm:$0xff]  }
 0x10f   : > { %v3807_v56 = vpop.f32.mrf.mxu0  ;;  %v1076_v29 = vpop.f32.mrf.mxu1 }
 0x110   : > { %v3808_v32 = vadd.f32 %v3807_v56, %v3806_v25  ;;  %v5074_v39 = vadd.f32 %v5020_v26, %v1076_v29 }
 0x111   : > { %v3809_v41 = vpop.f32.mrf.mxu0  ;;  %v4193_v3 = vpop.f32.mrf.mxu1 }
 0x112   : > { %v5077_v44 = vadd.f32 %v4193_v3, %v3793_v9 }
 0x113   : > { %v3810_v49 = vpop.f32.mrf.mxu0  ;;  %v1079_v30 = vpop.f32.mrf.mxu1 }
 0x114   : > { %v3811_v23 = vadd.f32 %v3810_v49, %v3809_v41  ;;  %v5081_v50 = vadd.f32 %v5030_v0, %v1079_v30  ;;  %v4532_v0 = vld [vmem:[%s4646_s14 + $0xb0] ss:$12 sps:$4 sm:$0xff]   ;;  %v4537_v49 = vld [vmem:[%s4646_s14 + $0x128] ss:$12 sps:$4 sm:$0xff]  }
 0x115   : > { %v3812_v33 = vpop.f32.mrf.mxu0  ;;  %v4196_v53 = vpop.f32.mrf.mxu1  ;;  %2848 = vmatmul.mubr.bf16.gmra.mxu0 %v4881_v36  ;;  %4291 = vmatmul.mubr.bf16.gmra.mxu1 %v4530_v43  ;;  %v4536_v43 = vld [vmem:[%s4646_s14 + $0x110] ss:$12 sps:$4 sm:$0xff]  }
 0x116   : > { %v5084_v26 = vadd.f32 %v4196_v53, %v3802_v13  ;;  %2855 = vmatprep.mubr.bf16.mxu0 %v4994_v24  ;;  %4294 = vmatprep.mubr.bf16.mxu1 %v4531_v46 }
 0x117   : > { %v3813_v54 = vpop.f32.mrf.mxu0  ;;  %v1092_v9 = vpop.f32.mrf.mxu1 }
 0x118   : > { %v3814_v57 = vadd.f32 %v3813_v54, %v3812_v33  ;;  %v5087_v12 = vadd.f32 %v3796_v61, %v1092_v9 }
 0x119   : > { %v3815_v58 = vpop.f32.mrf.mxu0  ;;  %v4197_v60 = vpop.f32.mrf.mxu1 }
 0x11a   : > { %v5090_v63 = vadd.f32 %v4197_v60, %v3805_v45 }
 0x11b   : > { %v3816_v4 = vpop.f32.mrf.mxu0  ;;  %v1095_v5 = vpop.f32.mrf.mxu1 }
 0x11c   : > { %v3817_v36 = vadd.f32 %v3816_v4, %v3815_v58  ;;  %v5093_v6 = vadd.f32 %v3799_v7, %v1095_v5  ;;  %v4534_v7 = vld [vmem:[%s4646_s14 + $0xe0] ss:$12 sps:$4 sm:$0xff]   ;;  %v4539_v5 = vld [vmem:[%s4646_s14 + $0x158] ss:$12 sps:$4 sm:$0xff]  }
 0x11d   : > { %v3818_v24 = vpop.f32.mrf.mxu0  ;;  %v4200_v8 = vpop.f32.mrf.mxu1  ;;  %2856 = vmatmul.mubr.bf16.gmra.mxu0 %v5001_v31  ;;  %4295 = vmatmul.mubr.bf16.gmra.mxu1 %v4532_v0 }
 0x11e   : > { %v5096_v61 = vadd.f32 %v4200_v8, %v3814_v57  ;;  %2863 = vmatprep.mubr.bf16.mxu0 %v5004_v34  ;;  %4298 = vmatprep.mubr.bf16.mxu1 %v4533_v1  ;;  %v4538_v1 = vld [vmem:[%s4646_s14 + $0x140] ss:$12 sps:$4 sm:$0xff]  }
 0x11f   : > { %v3819_v10 = vpop.f32.mrf.mxu0  ;;  %v1108_v22 = vpop.f32.mrf.mxu1 }
 0x120   : > { %v3820_v11 = vadd.f32 %v3819_v10, %v3818_v24  ;;  %v5099_v13 = vadd.f32 %v3808_v32, %v1108_v22 }
 0x121   : > { %v3821_v15 = vpop.f32.mrf.mxu0  ;;  %v4201_v16 = vpop.f32.mrf.mxu1 }
 0x122   : > { %v5102_v17 = vadd.f32 %v4201_v16, %v3817_v36 }
 0x123   : > { %v3822_v20 = vpop.f32.mrf.mxu0  ;;  %v1111_v31 = vpop.f32.mrf.mxu1 }
 0x124   : > { %v3823_v21 = vadd.f32 %v3822_v20, %v3821_v15  ;;  %v5105_v45 = vadd.f32 %v3811_v23, %v1111_v31  ;;  %v4543_v31 = vld [vmem:[%s4646_s14 + $0x19c] ss:$12 sps:$4 sm:$0xff]  }
 0x125   : > { %v3824_v34 = vpop.f32.mrf.mxu0  ;;  %v4204_v25 = vpop.f32.mrf.mxu1  ;;  %2864 = vmatmul.mubr.bf16.gmra.mxu0 %v5011_v38  ;;  %4299 = vmatmul.mubr.bf16.gmra.mxu1 %v4534_v7 }
 0x126   : > { %2871 = vmatprep.mubr.bf16.mxu0 %v5014_v40  ;;  %4302 = vmatprep.mubr.bf16.mxu1 %v4535_v19  ;;  %v4540_v19 = vld [vmem:[%s4646_s14 + $0x170] ss:$12 sps:$4 sm:$0xff]  }
 0x127   : > { %v3825_v52 = vpop.f32.mrf.mxu0  ;;  %v1124_v56 = vpop.f32.mrf.mxu1 }
 0x128   : > { %v3826_v29 = vadd.f32 %v3825_v52, %v3824_v34  ;;  %v5109_v32 = vadd.f32 %v3820_v11, %v1124_v56 }
 0x129   : > { %v3827_v41 = vpop.f32.mrf.mxu0  ;;  %v4205_v3 = vpop.f32.mrf.mxu1 }
 0x12a   : > { %v5112_v46 = vadd.f32 %v4204_v25, %v3826_v29 }
 0x12b   : > { %v3828_v30 = vpop.f32.mrf.mxu0  ;;  %v1127_v23 = vpop.f32.mrf.mxu1 }
 0x12c   : > { %v3829_v33 = vadd.f32 %v3828_v30, %v3827_v41  ;;  %v5115_v38 = vadd.f32 %v3823_v21, %v1127_v23  ;;  %v4544_v21 = vld [vmem:[%s4646_s14 + $0x188] ss:$12 sps:$4 sm:$0xff]  }
 0x12d   : > { %v3830_v40 = vpop.f32.mrf.mxu0  ;;  %v4208_v53 = vpop.f32.mrf.mxu1  ;;  %2872 = vmatmul.mubr.bf16.gmra.mxu0 %v5025_v35  ;;  %4303 = vmatmul.mubr.bf16.gmra.mxu1 %v4536_v43 }
 0x12e   : > { %v5118_v54 = vadd.f32 %v4205_v3, %v3829_v33  ;;  %2879 = vmatprep.mubr.bf16.mxu0 %v5028_v37  ;;  %4306 = vmatprep.mubr.bf16.mxu1 %v4537_v49  ;;  %v4541_v33 = vld [vmem:[%s4646_s14 + $0x198] ss:$12 sps:$4 sm:$0xff]  }
 0x12f   : > { %v3831_v9 = vpop.f32.mrf.mxu0  ;;  %v1140_v57 = vpop.f32.mrf.mxu1 }
 0x130   : > { %v3832_v58 = vadd.f32 %v3831_v9, %v3830_v40  ;;  %v4545_v40 = vld [vmem:[%s4646_s14 + $0x1a0] ss:$12 sps:$4 sm:$0xff]  }
 0x131   : > { %v3833_v60 = vpop.f32.mrf.mxu0  ;;  %v4209_v0 = vpop.f32.mrf.mxu1 }
 0x132   : > { %v5122_v4 = vadd.f32 %v3832_v58, %v1140_v57 }
 0x133   : > { %v3834_v36 = vpop.f32.mrf.mxu0  ;;  %v1143_v24 = vpop.f32.mrf.mxu1 }
 0x134   : > { %v3835_v35 = vadd.f32 %v3834_v36, %v3833_v60 }
 0x135   : > { %v3836_v8 = vpop.f32.mrf.mxu0  ;;  %v4212_v10 = vpop.f32.mrf.mxu1  ;;  %2880 = vmatmul.mubr.bf16.gmra.mxu0 %v5041_v28  ;;  %4307 = vmatmul.mubr.bf16.gmra.mxu1 %v4538_v1 }
 0x136   : > { %v5126_v37 = vadd.f32 %v3835_v35, %v1143_v24  ;;  %2887 = vmatprep.mubr.bf16.mxu0 %v5044_v51  ;;  %4310 = vmatprep.mubr.bf16.mxu1 %v4539_v5 }
 0x137   : > { %v3837_v22 = vpop.f32.mrf.mxu0  ;;  %v1156_v11 = vpop.f32.mrf.mxu1 }
 0x138   : > { %v3838_v15 = vadd.f32 %v3837_v22, %v3836_v8 }
 0x139   : > { %v3839_v16 = vpop.f32.mrf.mxu0  ;;  %v4213_v7 = vpop.f32.mrf.mxu1 }
 0x13a   : > { %v5130_v20 = vadd.f32 %v4208_v53, %v3838_v15 }
 0x13b   : > { %v3840_v34 = vpop.f32.mrf.mxu0  ;;  %v1159_v25 = vpop.f32.mrf.mxu1 }
 0x13c   : > { %v3841_v28 = vadd.f32 %v3840_v34, %v3839_v16 }
 0x13d   : > { %v3842_v52 = vpop.f32.mrf.mxu0  ;;  %v4216_v56 = vpop.f32.mrf.mxu1  ;;  %2888 = vmatmul.mubr.bf16.gmra.mxu0 %v5055_v2  ;;  %4311 = vmatmul.mubr.bf16.gmra.mxu1 %v4540_v19 }
 0x13e   : > { %v5135_v51 = vadd.f32 %v4209_v0, %v3841_v28  ;;  %v5138_v29 = vadd.f32 %v4216_v56, %v5038_v48  ;;  %2895 = vmatprep.mubr.bf16.mxu0 %v4543_v31  ;;  %4314 = vmatprep.mubr.bf16.mxu1 %v4544_v21 }
 0x13f   : > { %v3843_v41 = vpop.f32.mrf.mxu0  ;;  %v1172_v3 = vpop.f32.mrf.mxu1 }
 0x140   : > { %v3844_v43 = vadd.f32 %v3843_v41, %v3842_v52  ;;  %v5141_v49 = vadd.f32 %v5022_v59, %v1172_v3 }
 0x141   : > { %v3845_v30 = vpop.f32.mrf.mxu0  ;;  %v4217_v23 = vpop.f32.mrf.mxu1 }
 0x142   : > { %v5145_v53 = vadd.f32 %v3844_v43, %v1156_v11  ;;  %v5148_v2 = vadd.f32 %v4217_v23, %v5046_v55 }
 0x143   : > { %v3846_v9 = vpop.f32.mrf.mxu0  ;;  %v1175_v48 = vpop.f32.mrf.mxu1 }
 0x144   : > { %v3847_v57 = vadd.f32 %v3846_v9, %v3845_v30  ;;  %v5151_v58 = vadd.f32 %v5032_v42, %v1175_v48 }
 0x145   : > { %v3848_v60 = vpop.f32.mrf.mxu0  ;;  %v4220_v0 = vpop.f32.mrf.mxu1  ;;  %2896 = vmatmul.mubr.bf16.gmra.mxu0 %v4541_v33  ;;  %4315 = vmatmul.mubr.bf16.gmra.mxu1 %v4545_v40 }
 0x146   : > { %v5153_v59 = vadd.f32 %v3847_v57, %v1159_v25  ;;  %v5156_v1 = vadd.f32 %v4220_v0, %v5063_v14 }
 0x147   : > { %v3849_v5 = vpop.f32.mrf.mxu0  ;;  %v1188_v36 = vpop.f32.mrf.mxu1 }
 0x148   : > { %v3850_v24 = vadd.f32 %v3849_v5, %v3848_v60  ;;  %v5159_v55 = vadd.f32 %v5052_v62, %v1188_v36 }
 0x149   : > { %v3851_v35 = vpop.f32.mrf.mxu0  ;;  %v4221_v8 = vpop.f32.mrf.mxu1 }
 0x14a   : > { %v5161_v22 = vadd.f32 %v4212_v10, %v3850_v24  ;;  %v5164_v42 = vadd.f32 %v4221_v8, %v5067_v47 }
 0x14b   : > { %v3852_v11 = vpop.f32.mrf.mxu0  ;;  %v1191_v15 = vpop.f32.mrf.mxu1 }
 0x14c   : > { %v3853_v16 = vadd.f32 %v3852_v11, %v3851_v35  ;;  %v5167_v19 = vadd.f32 %v5058_v18, %v1191_v15 }
 0x14d   : > { %v3918_v14 = vpop.f32.mrf.mxu1  ;;  %v4240_v31 = vpop.f32.mrf.mxu0 }
 0x14e   : > { %v5169_v21 = vadd.f32 %v4213_v7, %v3853_v16 }
 0x14f   : > { %v3919_v34 = vpop.f32.mrf.mxu1  ;;  %v2007_v62 = vpop.f32.mrf.mxu0 }
 0x150   : > { %v3920_v25 = vadd.f32 %v3919_v34, %v3918_v14 }
 0x151   : > { %v3921_v28 = vpop.f32.mrf.mxu1  ;;  %v4241_v52 = vpop.f32.mrf.mxu0 }
 0x152   : > { %v2008_v10 = vadd.f32 %v3920_v25, %v2007_v62 }
 0x153   : > { %v3922_v56 = vpop.f32.mrf.mxu1  ;;  %v2010_v41 = vpop.f32.mrf.mxu0 }
 0x154   : > { %v5172_v47 = vadd.f32 %v2008_v10, %v5074_v39  ;;  %v3923_v3 = vadd.f32 %v3922_v56, %v3921_v28 }
 0x155   : > { %v3924_v43 = vpop.f32.mrf.mxu1  ;;  %v4244_v30 = vpop.f32.mrf.mxu0 }
 0x156   : > { %v2011_v18 = vadd.f32 %v3923_v3, %v2010_v41 }
 0x157   : > { %v3925_v23 = vpop.f32.mrf.mxu1  ;;  %v2023_v33 = vpop.f32.mrf.mxu0 }
 0x158   : > { %v5175_v7 = vadd.f32 %v2011_v18, %v5081_v50  ;;  %v3926_v40 = vadd.f32 %v3925_v23, %v3924_v43 }
 0x159   : > { %v3927_v9 = vpop.f32.mrf.mxu1  ;;  %v4245_v48 = vpop.f32.mrf.mxu0 }
 0x15a   : > { %v2016_v57 = vadd.f32 %v4240_v31, %v3926_v40 }
 0x15b   : > { %v3928_v60 = vpop.f32.mrf.mxu1  ;;  %v2026_v0 = vpop.f32.mrf.mxu0 }
 0x15c   : > { %v5178_v5 = vadd.f32 %v2016_v57, %v5070_v27  ;;  %v3929_v39 = vadd.f32 %v3928_v60, %v3927_v9 }
 0x15d   : > { %v3930_v36 = vpop.f32.mrf.mxu1  ;;  %v4248_v24 = vpop.f32.mrf.mxu0 }
 0x15e   : > { %v2019_v35 = vadd.f32 %v4241_v52, %v3929_v39 }
 0x15f   : > { %v3931_v8 = vpop.f32.mrf.mxu1  ;;  %v2039_v11 = vpop.f32.mrf.mxu0 }
 0x160   : > { %v5181_v15 = vadd.f32 %v2019_v35, %v5077_v44  ;;  %v3932_v50 = vadd.f32 %v3931_v8, %v3930_v36 }
 0x161   : > { %v3933_v16 = vpop.f32.mrf.mxu1  ;;  %v4249_v14 = vpop.f32.mrf.mxu0 }
 0x162   : > { %v2024_v34 = vadd.f32 %v3932_v50, %v2023_v33 }
 0x163   : > { %v3934_v62 = vpop.f32.mrf.mxu1  ;;  %v2042_v31 = vpop.f32.mrf.mxu0 }
 0x164   : > { %v5184_v25 = vadd.f32 %v2024_v34, %v5087_v12  ;;  %v3935_v27 = vadd.f32 %v3934_v62, %v3933_v16 }
 0x165   : > { %v3936_v28 = vpop.f32.mrf.mxu1  ;;  %v5186_v10 = vpop.f32.mrf.mxu0 }
 0x166   : > { %v2027_v56 = vadd.f32 %v3935_v27, %v2026_v0 }
 0x167   : > { %v3937_v52 = vpop.f32.mrf.mxu1  ;;  %v2055_v41 = vpop.f32.mrf.mxu0 }
 0x168   : > { %v5189_v3 = vadd.f32 %v2027_v56, %v5093_v6  ;;  %v3938_v44 = vadd.f32 %v3937_v52, %v3936_v28 }
 0x169   : > { %v3939_v43 = vpop.f32.mrf.mxu1  ;;  %v5191_v18 = vpop.f32.mrf.mxu0 }
 0x16a   : > { %v2032_v23 = vadd.f32 %v4244_v30, %v3938_v44 }
 0x16b   : > { %v3940_v33 = vpop.f32.mrf.mxu1  ;;  %v2058_v40 = vpop.f32.mrf.mxu0 }
 0x16c   : > { %v5194_v12 = vadd.f32 %v2032_v23, %v5084_v26  ;;  %v3941_v9 = vadd.f32 %v3940_v33, %v3939_v43 }
 0x16d   : > { %v3942_v57 = vpop.f32.mrf.mxu1  ;;  %v5196_v60 = vpop.f32.mrf.mxu0 }
 0x16e   : > { %v2035_v0 = vadd.f32 %v4245_v48, %v3941_v9 }
 0x16f   : > { %v3943_v39 = vpop.f32.mrf.mxu1  ;;  %v2071_v36 = vpop.f32.mrf.mxu0 }
 0x170   : > { %v5199_v6 = vadd.f32 %v2035_v0, %v5090_v63  ;;  %v3944_v35 = vadd.f32 %v3943_v39, %v3942_v57 }
 0x171   : > { %v3945_v8 = vpop.f32.mrf.mxu1  ;;  %v5201_v50 = vpop.f32.mrf.mxu0 }
 0x172   : > { %v2040_v30 = vadd.f32 %v3944_v35, %v2039_v11 }
 0x173   : > { %v3946_v16 = vpop.f32.mrf.mxu1  ;;  %v2074_v34 = vpop.f32.mrf.mxu0 }
 0x174   : > { %v5204_v26 = vadd.f32 %v2040_v30, %v5099_v13  ;;  %v3947_v62 = vadd.f32 %v3946_v16, %v3945_v8 }
 0x175   : > { %v3948_v27 = vpop.f32.mrf.mxu1  ;;  %v5206_v28 = vpop.f32.mrf.mxu0 }
 0x176   : > { %v2043_v48 = vadd.f32 %v3947_v62, %v2042_v31 }
 0x177   : > { %v3949_v56 = vpop.f32.mrf.mxu1  ;;  %v5208_v52 = vpop.f32.mrf.mxu0 }
 0x178   : > { %v5211_v63 = vadd.f32 %v2043_v48, %v5105_v45  ;;  %v3950_v44 = vadd.f32 %v3949_v56, %v3948_v27 }
 0x179   : > { %v3951_v43 = vpop.f32.mrf.mxu1  ;;  %v5213_v23 = vpop.f32.mrf.mxu0 }
 0x17a   : > { %v2048_v11 = vadd.f32 %v4248_v24, %v3950_v44 }
 0x17b   : > { %v3952_v33 = vpop.f32.mrf.mxu1  ;;  %v5215_v9 = vpop.f32.mrf.mxu0 }
 0x17c   : > { %v5218_v13 = vadd.f32 %v2048_v11, %v5096_v61  ;;  %v3953_v57 = vadd.f32 %v3952_v33, %v3951_v43 }
 0x17d   : > { %v3954_v0 = vpop.f32.mrf.mxu1  ;;  %v5220_v31 = vpop.f32.mrf.mxu0 }
 0x17e   : > { %v2051_v39 = vadd.f32 %v4249_v14, %v3953_v57 }
 0x17f   : > { %v3955_v35 = vpop.f32.mrf.mxu1  ;;  %v5222_v8 = vpop.f32.mrf.mxu0 }
 0x180   : > { %v5225_v45 = vadd.f32 %v2051_v39, %v5102_v17  ;;  %v3956_v30 = vadd.f32 %v3955_v35, %v3954_v0 }
 0x181   : > { %v3957_v16 = vpop.f32.mrf.mxu1  ;;  %v5227_v24 = vpop.f32.mrf.mxu0 }
 0x182   : > { %v2056_v62 = vadd.f32 %v3956_v30, %v2055_v41 }
 0x183   : > { %v3958_v27 = vpop.f32.mrf.mxu1  ;;  %v5229_v48 = vpop.f32.mrf.mxu0 }
 0x184   : > { %v5232_v61 = vadd.f32 %v2056_v62, %v5109_v32  ;;  %v3959_v56 = vadd.f32 %v3958_v27, %v3957_v16 }
 0x185   : > { %v3960_v44 = vpop.f32.mrf.mxu1  ;;  %v5234_v14 = vpop.f32.mrf.mxu0 }
 0x186   : > { %5623 = vst [vmem:[#allocation2_spill] sm:$0xff] %v5232_v61  ;;  %v2059_v43 = vadd.f32 %v3959_v56, %v2058_v40 }
 0x187   : > { %v3961_v11 = vpop.f32.mrf.mxu1  ;;  %v5236_v33 = vpop.f32.mrf.mxu0 }
 0x188   : > { %v5239_v17 = vadd.f32 %v2059_v43, %v5115_v38  ;;  %v3962_v57 = vadd.f32 %v3961_v11, %v3960_v44 }
 0x189   : > { %v3963_v0 = vpop.f32.mrf.mxu1  ;;  %v5241_v41 = vpop.f32.mrf.mxu0 }
 0x18a   : > { %5624 = vst [vmem:[#allocation3_spill] sm:$0xff] %v5239_v17  ;;  %v2064_v39 = vadd.f32 %v5186_v10, %v3962_v57 }
 0x18b   : > { %v3964_v35 = vpop.f32.mrf.mxu1  ;;  %v5244_v32 = vpop.f32.mrf.mxu0 }
 0x18c   : > { %v5247_v30 = vadd.f32 %v2064_v39, %v5112_v46  ;;  %v3965_v16 = vadd.f32 %v3964_v35, %v3963_v0 }
 0x18d   : > { %v3966_v40 = vpop.f32.mrf.mxu1  ;;  %v5249_v62 = vpop.f32.mrf.mxu0 }
 0x18e   : > { %5625 = vst [vmem:[#allocation4_spill] sm:$0xff] %v5247_v30  ;;  %v2067_v27 = vadd.f32 %v5191_v18, %v3965_v16 }
 0x18f   : > { %v3967_v38 = vpop.f32.mrf.mxu1  ;;  %v5252_v56 = vpop.f32.mrf.mxu0 }
 0x190   : > { %v5255_v44 = vadd.f32 %v2067_v27, %v5118_v54  ;;  %v3968_v43 = vadd.f32 %v3967_v38, %v3966_v40 }
 0x191   : > { %v3969_v10 = vpop.f32.mrf.mxu1  ;;  %v5257_v11 = vpop.f32.mrf.mxu0 }
 0x192   : > { %v2072_v57 = vadd.f32 %v3968_v43, %v2071_v36 }
 0x193   : > { %v3970_v17 = vpop.f32.mrf.mxu1  ;;  %v5259_v46 = vpop.f32.mrf.mxu0 }
 0x194   : > { %v5262_v0 = vadd.f32 %v2072_v57, %v5122_v4  ;;  %v3971_v39 = vadd.f32 %v3970_v17, %v3969_v10 }
 0x195   : > { %v3972_v35 = vpop.f32.mrf.mxu1  ;;  %v5264_v18 = vpop.f32.mrf.mxu0 }
 0x196   : > { %5626 = vst [vmem:[#allocation5_spill] sm:$0xff] %v5262_v0  ;;  %v2075_v16 = vadd.f32 %v3971_v39, %v2074_v34 }
 0x197   : > { %v3973_v61 = vpop.f32.mrf.mxu1  ;;  %v5266_v30 = vpop.f32.mrf.mxu0 }
 0x198   : > { %v5269_v54 = vadd.f32 %v2075_v16, %v5126_v37  ;;  %v3974_v40 = vadd.f32 %v3973_v61, %v3972_v35 }
 0x199   : > { %v3975_v27 = vpop.f32.mrf.mxu1  ;;  %v5271_v36 = vpop.f32.mrf.mxu0 }
 0x19a   : > { %5627 = vst [vmem:[#allocation6_spill] sm:$0xff] %v5269_v54  ;;  %v2080_v38 = vadd.f32 %v5196_v60, %v3974_v40 }
 0x19b   : > { %v3976_v43 = vpop.f32.mrf.mxu1  ;;  %v5274_v4 = vpop.f32.mrf.mxu0 }
 0x19c   : > { %v5277_v17 = vadd.f32 %v2080_v38, %v5130_v20  ;;  %v3977_v10 = vadd.f32 %v3976_v43, %v3975_v27 }
 0x19d   : > { %v3978_v34 = vpop.f32.mrf.mxu1  ;;  %v5279_v57 = vpop.f32.mrf.mxu0 }
 0x19e   : > { %v2083_v39 = vadd.f32 %v5201_v50, %v3977_v10 }
 0x19f   : > { %v3979_v37 = vpop.f32.mrf.mxu1  ;;  %v5282_v16 = vpop.f32.mrf.mxu0 }
 0x1a0   : > { %v5285_v61 = vadd.f32 %v2083_v39, %v5135_v51  ;;  %v3980_v35 = vadd.f32 %v3979_v37, %v3978_v34 }
 0x1a1   : > { %v3981_v60 = vpop.f32.mrf.mxu1  ;;  %v5287_v40 = vpop.f32.mrf.mxu0 }
 0x1a2   : > { %5628 = vst [vmem:[#allocation7_spill] sm:$0xff] %v5285_v61  ;;  %v2088_v54 = vadd.f32 %v3980_v35, %v5208_v52 }
 0x1a3   : > { %v3982_v20 = vpop.f32.mrf.mxu1  ;;  %v5290_v38 = vpop.f32.mrf.mxu0 }
 0x1a4   : > { %v5293_v27 = vadd.f32 %v2088_v54, %v5145_v53  ;;  %v3983_v43 = vadd.f32 %v3982_v20, %v3981_v60 }
 0x1a5   : > { %v3984_v50 = vpop.f32.mrf.mxu1  ;;  %v5295_v10 = vpop.f32.mrf.mxu0 }
 0x1a6   : > { %5629 = vst [vmem:[#allocation8_spill] sm:$0xff] %v5293_v27  ;;  %v2091_v0 = vadd.f32 %v3983_v43, %v5215_v9 }
 0x1a7   : > { %v3985_v51 = vpop.f32.mrf.mxu1  ;;  %v5298_v39 = vpop.f32.mrf.mxu0 }
 0x1a8   : > { %v5301_v34 = vadd.f32 %v2091_v0, %v5153_v59  ;;  %v3986_v37 = vadd.f32 %v3985_v51, %v3984_v50 }
 0x1a9   : > { %v3987_v52 = vpop.f32.mrf.mxu1  ;;  %v5303_v35 = vpop.f32.mrf.mxu0 }
 0x1aa   : > { %5630 = vst [vmem:[#allocation9_spill] sm:$0xff] %v5301_v34  ;;  %v2096_v61 = vadd.f32 %v5206_v28, %v3986_v37 }
 0x1ab   : > { %v3988_v53 = vpop.f32.mrf.mxu1  ;;  %v5306_v54 = vpop.f32.mrf.mxu0 }
 0x1ac   : > { %v5309_v60 = vadd.f32 %v2096_v61, %v5161_v22  ;;  %v3989_v20 = vadd.f32 %v3988_v53, %v3987_v52 }
 0x1ad   : > { %v3990_v9 = vpop.f32.mrf.mxu1  ;;  %v5311_v43 = vpop.f32.mrf.mxu0 }
 0x1ae   : > { %5631 = vst [vmem:[#allocation10_spill] sm:$0xff] %v5309_v60  ;;  %v2099_v27 = vadd.f32 %v5213_v23, %v3989_v20 }
 0x1af   : > { %v3991_v59 = vpop.f32.mrf.mxu1  ;;  %v5314_v0 = vpop.f32.mrf.mxu0 }
 0x1b0   : > { %v5317_v50 = vadd.f32 %v2099_v27, %v5169_v21  ;;  %v3992_v51 = vadd.f32 %v3991_v59, %v3990_v9 }
 0x1b1   : > { %v3993_v28 = vpop.f32.mrf.mxu1  ;;  %v5319_v37 = vpop.f32.mrf.mxu0 }
 0x1b2   : > { %5632 = vst [vmem:[#allocation11_spill] sm:$0xff] %v5317_v50  ;;  %v2104_v34 = vadd.f32 %v3992_v51, %v5222_v8 }
 0x1b3   : > { %v3994_v22 = vpop.f32.mrf.mxu1  ;;  %v5322_v61 = vpop.f32.mrf.mxu0 }
 0x1b4   : > { %v5325_v52 = vadd.f32 %v2104_v34, %v5141_v49  ;;  %v3995_v53 = vadd.f32 %v3994_v22, %v3993_v28 }
 0x1b5   : > { %v3996_v23 = vpop.f32.mrf.mxu1  ;;  %v5327_v20 = vpop.f32.mrf.mxu0 }
 0x1b6   : > { %5633 = vst [vmem:[#allocation12_spill] sm:$0xff] %v5325_v52  ;;  %v2107_v60 = vadd.f32 %v3995_v53, %v5229_v48 }
 0x1b7   : > { %v3997_v21 = vpop.f32.mrf.mxu1  ;;  %v5330_v27 = vpop.f32.mrf.mxu0 }
 0x1b8   : > { %v5333_v9 = vadd.f32 %v2107_v60, %v5151_v58  ;;  %v3998_v59 = vadd.f32 %v3997_v21, %v3996_v23 }
 0x1b9   : > { %v3999_v8 = vpop.f32.mrf.mxu1  ;;  %v5335_v51 = vpop.f32.mrf.mxu0 }
 0x1ba   : > { %5634 = vst [vmem:[#allocation13_spill] sm:$0xff] %v5333_v9  ;;  %v2112_v50 = vadd.f32 %v5220_v31, %v3998_v59 }
 0x1bb   : > { %v4000_v49 = vpop.f32.mrf.mxu1  ;;  %v5338_v34 = vpop.f32.mrf.mxu0 }
 0x1bc   : > { %v5341_v28 = vadd.f32 %v2112_v50, %v5138_v29  ;;  %v4001_v22 = vadd.f32 %v4000_v49, %v3999_v8 }
 0x1bd   : > { %v4002_v48 = vpop.f32.mrf.mxu1  ;;  %v5343_v53 = vpop.f32.mrf.mxu0 }
 0x1be   : > { %5635 = vst [vmem:[#allocation14_spill] sm:$0xff] %v5341_v28  ;;  %v2115_v52 = vadd.f32 %v5227_v24, %v4001_v22 }
 0x1bf   : > { %v4003_v58 = vpop.f32.mrf.mxu1  ;;  %v5346_v60 = vpop.f32.mrf.mxu0 }
 0x1c0   : > { %v5349_v23 = vadd.f32 %v2115_v52, %v5148_v2  ;;  %v4004_v21 = vadd.f32 %v4003_v58, %v4002_v48 }
 0x1c1   : > { %v4005_v31 = vpop.f32.mrf.mxu1  ;;  %v5351_v59 = vpop.f32.mrf.mxu0 }
 0x1c2   : > { %5636 = vst [vmem:[#allocation15_spill] sm:$0xff] %v5349_v23  ;;  %v2120_v9 = vadd.f32 %v4004_v21, %v5236_v33 }
 0x1c3   : > { %v4006_v29 = vpop.f32.mrf.mxu1  ;;  %v5354_v50 = vpop.f32.mrf.mxu0 }
 0x1c4   : > { %v5357_v8 = vadd.f32 %v2120_v9, %v5159_v55  ;;  %v4007_v49 = vadd.f32 %v4006_v29, %v4005_v31  ;;  %v4062_v31 = vadd.f32 %v5266_v30, %v5264_v18  ;;  %v4065_v18 = vadd.f32 %v5274_v4, %v5271_v36 }
 0x1c5   : > { %v4008_v24 = vpop.f32.mrf.mxu1  ;;  %v5359_v22 = vpop.f32.mrf.mxu0 }
 0x1c6   : > { %v2123_v28 = vadd.f32 %v4007_v49, %v5244_v32 }
 0x1c7   : > { %v4009_v2 = vpop.f32.mrf.mxu1  ;;  %v5362_v52 = vpop.f32.mrf.mxu0 }
 0x1c8   : > { %v5365_v48 = vadd.f32 %v2123_v28, %v5167_v19  ;;  %v4010_v58 = vadd.f32 %v4009_v2, %v4008_v24  ;;  %v4056_v28 = vadd.f32 %v5252_v56, %v5249_v62  ;;  %v5385_v2 = vld [vmem:[%s5620_s2] ss:$0 sm:$0xff] }
 0x1c9   : > { %v4011_v33 = vpop.f32.mrf.mxu1  ;;  %v5367_v21 = vpop.f32.mrf.mxu0 }
 0x1ca   : > { %v2128_v23 = vadd.f32 %v5234_v14, %v4010_v58 }
 0x1cb   : > { %v4012_v55 = vpop.f32.mrf.mxu1  ;;  %v5370_v9 = vpop.f32.mrf.mxu0 }
 0x1cc   : > { %v5375_v32 = vadd.f32 %v2128_v23, %v5156_v1  ;;  %v4013_v29 = vadd.f32 %v4012_v55, %v4011_v33 }
 0x1cd   : > { %v5377_v49 = vpop.f32.mrf.mxu0  ;;  %v4288_v19 = vpop.f32.mrf.mxu1 }
 0x1ce   : > { %v2131_v24 = vadd.f32 %v5241_v41, %v4013_v29  ;;  %v2947_v14 = vadd.f32 %v4288_v19, %v4062_v31  ;;  %v5398_v41 = vld [vmem:[%s5621_s3] ss:$0 sm:$0xff]  ;;  %v4074_v29 = vadd.f32 %v5298_v39, %v5295_v10 }
 0x1cf   : > { %v5387_v30 = vpop.f32.mrf.mxu0  ;;  %v2938_v1 = vpop.f32.mrf.mxu1 }
 0x1d0   : > { %v5392_v23 = vadd.f32 %v2131_v24, %v5164_v42  ;;  %v3067_v58 = vadd.f32 %v2947_v14, %v5178_v5  ;;  %v2939_v62 = vadd.f32 %v4056_v28, %v2938_v1  ;;  %v4059_v42 = vadd.f32 %v5259_v46, %v5257_v11 }
 0x1d1   : > { %v5400_v56 = vpop.f32.mrf.mxu0  ;;  %v4289_v33 = vpop.f32.mrf.mxu1 }
 0x1d2   : > { %v3173_v55 = vmul.f32 %v5385_v2, %v3067_v58  ;;  %v3065_v31 = vadd.f32 %v2939_v62, %v5172_v47  ;;  %v2950_v36 = vadd.f32 %v4289_v33, %v4065_v18  ;;  %v4077_v33 = vadd.f32 %v5306_v54, %v5303_v35 }
 0x1d3   : > { %v5407_v4 = vpop.f32.mrf.mxu0  ;;  %v2941_v5 = vpop.f32.mrf.mxu1 }
 0x1d4   : > { %v3212_v19 = vadd.f32 %v5398_v41, %v3173_v55  ;;  %v3171_v28 = vmul.f32 %v5385_v2, %v3065_v31  ;;  %v3068_v24 = vadd.f32 %v2950_v36, %v5181_v15  ;;  %v2942_v47 = vadd.f32 %v4059_v42, %v2941_v5 }
 0x1d5   : > { %v5419_v11 = vpop.f32.mrf.mxu0  ;;  %v4292_v46 = vpop.f32.mrf.mxu1  ;;  %v4068_v15 = vadd.f32 %v5282_v16, %v5279_v57 }
 0x1d6   : > { %v3244_v14 = vmax.f32 %v3212_v19, 0.0  ;;  %v3210_v1 = vadd.f32 %v5398_v41, %v3171_v28  ;;  %v3174_v10 = vmul.f32 %v5385_v2, %v3068_v24  ;;  %v2963_v39 = vadd.f32 %v4292_v46, %v4074_v29 }
 0x1d7   : > { %v3066_v18 = vadd.f32 %v2942_v47, %v5175_v7  ;;  %v5426_v58 = vpop.f32.mrf.mxu0  ;;  %v2954_v62 = vpop.f32.mrf.mxu1  ;;  %v4071_v7 = vadd.f32 %v5290_v38, %v5287_v40  ;;  %v4086_v47 = vadd.f32 %v5330_v27, %v5327_v20  ;;  %v4080_v20 = vadd.f32 %v5314_v0, %v5311_v43 }
 0x1d8   : > { %3276 = vst [vmem:[%s5417_s24 + $0x10] sm:$0xff] %v3244_v14  ;;  %v3242_v55 = vmax.f32 %v3210_v1, 0.0  ;;  %v3213_v31 = vadd.f32 %v5398_v41, %v3174_v10  ;;  %v3071_v36 = vadd.f32 %v2963_v39, %v5194_v12  ;;  %v2955_v5 = vadd.f32 %v4068_v15, %v2954_v62 }
 0x1d9   : > { %v3172_v42 = vmul.f32 %v5385_v2, %v3066_v18  ;;  %v5434_v29 = vpop.f32.mrf.mxu0  ;;  %v4293_v57 = vpop.f32.mrf.mxu1 }
 0x1da   : > { %3274 = vst [vmem:[%s5417_s24] sm:$0xff] %v3242_v55  ;;  %v3245_v16 = vmax.f32 %v3213_v31, 0.0  ;;  %v3177_v35 = vmul.f32 %v5385_v2, %v3071_v36  ;;  %v2966_v54 = vadd.f32 %v4293_v57, %v4077_v33  ;;  %v3069_v28 = vadd.f32 %v2955_v5, %v5184_v25 }
 0x1db   : > { %v3211_v19 = vadd.f32 %v5398_v41, %v3172_v42  ;;  %v5442_v24 = vpop.f32.mrf.mxu0  ;;  %v2957_v12 = vpop.f32.mrf.mxu1  ;;  %v4089_v55 = vadd.f32 %v5338_v34, %v5335_v51  ;;  %v4083_v51 = vadd.f32 %v5322_v61, %v5319_v37 }
 0x1dc   : > { %3277 = vst [vmem:[%s5417_s24 + $0x18] sm:$0xff] %v3245_v16  ;;  %v3216_v46 = vadd.f32 %v5398_v41, %v3177_v35  ;;  %v3072_v40 = vadd.f32 %v2966_v54, %v5199_v6  ;;  %v2958_v38 = vadd.f32 %v4071_v7, %v2957_v12  ;;  %v3175_v1 = vmul.f32 %v5385_v2, %v3069_v28 }
 0x1dd   : > { %v3243_v14 = vmax.f32 %v3211_v19, 0.0  ;;  %v5450_v10 = vpop.f32.mrf.mxu0  ;;  %v4296_v25 = vpop.f32.mrf.mxu1  ;;  %v4098_v19 = vadd.f32 %v5362_v52, %v5359_v22 }
 0x1de   : > { %v3248_v39 = vmax.f32 %v3216_v46, 0.0  ;;  %v3178_v15 = vmul.f32 %v5385_v2, %v3072_v40  ;;  %v3070_v18 = vadd.f32 %v2958_v38, %v5189_v3  ;;  %v2979_v62 = vadd.f32 %v4296_v25, %v4086_v47 }
 0x1df   : > { %3275 = vst [vmem:[%s5417_s24 + $0x8] sm:$0xff] %v3243_v14  ;;  %v3214_v6 = vadd.f32 %v5398_v41, %v3175_v1  ;;  %v5458_v27 = vpop.f32.mrf.mxu0  ;;  %v2970_v33 = vpop.f32.mrf.mxu1 }
 0x1e0   : > { %3280 = vst [vmem:[%s5417_s24 + $0x30] sm:$0xff] %v3248_v39  ;;  %v3217_v31 = vadd.f32 %v5398_v41, %v3178_v15  ;;  %v3176_v36 = vmul.f32 %v5385_v2, %v3070_v18  ;;  %v3075_v3 = vadd.f32 %v2979_v62, %v5218_v13  ;;  %v2971_v43 = vadd.f32 %v4080_v20, %v2970_v33  ;;  %v5637_v18 = vld [vmem:[#allocation4_spill] sm:$0xff] }
 0x1e1   : > { %v3246_v42 = vmax.f32 %v3214_v6, 0.0  ;;  %v5466_v0 = vpop.f32.mrf.mxu0  ;;  %v4297_v5 = vpop.f32.mrf.mxu1  ;;  %v4101_v39 = vadd.f32 %v5370_v9, %v5367_v21  ;;  %v4095_v21 = vadd.f32 %v5354_v50, %v5351_v59 }
 0x1e2   : > { %v3249_v57 = vmax.f32 %v3217_v31, 0.0  ;;  %v3215_v7 = vadd.f32 %v5398_v41, %v3176_v36  ;;  %v3181_v16 = vmul.f32 %v5385_v2, %v3075_v3  ;;  %v2982_v35 = vadd.f32 %v4297_v5, %v4089_v55  ;;  %v5638_v31 = vld [vmem:[#allocation2_spill] sm:$0xff] }
 0x1e3   : > { %3278 = vst [vmem:[%s5417_s24 + $0x20] sm:$0xff] %v3246_v42  ;;  %v3073_v34 = vadd.f32 %v2971_v43, %v5204_v26  ;;  %v5474_v54 = vpop.f32.mrf.mxu0  ;;  %v2973_v13 = vpop.f32.mrf.mxu1  ;;  %v4092_v26 = vadd.f32 %v5346_v60, %v5343_v53  ;;  %v4110_v5 = vadd.f32 %v5426_v58, %v5419_v11  ;;  %v4104_v11 = vadd.f32 %v5387_v30, %v5377_v49  ;;  %v5639_v58 = vld [vmem:[#allocation3_spill] sm:$0xff] }
 0x1e4   : > { %3281 = vst [vmem:[%s5417_s24 + $0x38] sm:$0xff] %v3249_v57  ;;  %v3247_v28 = vmax.f32 %v3215_v7, 0.0  ;;  %v3220_v12 = vadd.f32 %v5398_v41, %v3181_v16  ;;  %v3076_v47 = vadd.f32 %v2982_v35, %v5225_v45  ;;  %v2974_v40 = vadd.f32 %v4083_v51, %v2973_v13 }
 0x1e5   : > { %v3179_v46 = vmul.f32 %v5385_v2, %v3073_v34  ;;  %v5482_v37 = vpop.f32.mrf.mxu0  ;;  %v4300_v61 = vpop.f32.mrf.mxu1 }
 0x1e6   : > { %3279 = vst [vmem:[%s5417_s24 + $0x28] sm:$0xff] %v3247_v28  ;;  %v3252_v38 = vmax.f32 %v3220_v12, 0.0  ;;  %v3182_v22 = vmul.f32 %v5385_v2, %v3076_v47  ;;  %v2995_v52 = vadd.f32 %v4300_v61, %v4098_v19  ;;  %v3074_v1 = vadd.f32 %v2974_v40, %v5211_v63 }
 0x1e7   : > { %v3218_v14 = vadd.f32 %v5398_v41, %v3179_v46  ;;  %v4121_v25 = vpop.f32.mrf.mxu0  ;;  %v2986_v45 = vpop.f32.mrf.mxu1  ;;  %v4113_v46 = vadd.f32 %v5442_v24, %v5434_v29 }
 0x1e8   : > { %3284 = vst [vmem:[%s5417_s24 + $0x50] sm:$0xff] %v3252_v38  ;;  %v3221_v15 = vadd.f32 %v5398_v41, %v3182_v22  ;;  %v3079_v53 = vadd.f32 %v2995_v52, %v5637_v18  ;;  %v2987_v60 = vadd.f32 %v4092_v26, %v2986_v45  ;;  %v3180_v20 = vmul.f32 %v5385_v2, %v3074_v1  ;;  %v5640_v45 = vld [vmem:[#allocation5_spill] sm:$0xff] }
 0x1e9   : > { %v3250_v62 = vmax.f32 %v3218_v14, 0.0  ;;  %v5496_v6 = vpop.f32.mrf.mxu0  ;;  %v4301_v33 = vpop.f32.mrf.mxu1  ;;  %v4107_v52 = vadd.f32 %v5407_v4, %v5400_v56  ;;  %v4122_v18 = vadd.f32 %v4121_v25, %v5482_v37  ;;  %v4116_v37 = vadd.f32 %v5458_v27, %v5450_v10 }
 0x1ea   : > { %v3253_v63 = vmax.f32 %v3221_v15, 0.0  ;;  %v3185_v55 = vmul.f32 %v5385_v2, %v3079_v53  ;;  %v3077_v36 = vadd.f32 %v2987_v60, %v5638_v31  ;;  %v2998_v3 = vadd.f32 %v4301_v33, %v4101_v39  ;;  %v5641_v60 = vld [vmem:[#allocation7_spill] sm:$0xff] }
 0x1eb   : > { %3282 = vst [vmem:[%s5417_s24 + $0x40] sm:$0xff] %v3250_v62  ;;  %v3219_v9 = vadd.f32 %v5398_v41, %v3180_v20  ;;  %v4124_v42 = vpop.f32.mrf.mxu0  ;;  %v2989_v43 = vpop.f32.mrf.mxu1 }
 0x1ec   : > { %3285 = vst [vmem:[%s5417_s24 + $0x58] sm:$0xff] %v3253_v63  ;;  %v3224_v57 = vadd.f32 %v5398_v41, %v3185_v55  ;;  %v3183_v7 = vmul.f32 %v5385_v2, %v3077_v36  ;;  %v3080_v16 = vadd.f32 %v2998_v3, %v5255_v44  ;;  %v2990_v51 = vadd.f32 %v4095_v21, %v2989_v43  ;;  %v5642_v36 = vld [vmem:[#allocation6_spill] sm:$0xff] }
 0x1ed   : > { %v3251_v35 = vmax.f32 %v3219_v9, 0.0  ;;  %v5510_v59 = vpop.f32.mrf.mxu0  ;;  %v4304_v50 = vpop.f32.mrf.mxu1 }
 0x1ee   : > { %v3256_v34 = vmax.f32 %v3224_v57, 0.0  ;;  %v3222_v13 = vadd.f32 %v5398_v41, %v3183_v7  ;;  %v3186_v19 = vmul.f32 %v5385_v2, %v3080_v16  ;;  %v3011_v28 = vadd.f32 %v4304_v50, %v4110_v5  ;;  %v5643_v16 = vld [vmem:[#allocation10_spill] sm:$0xff] }
 0x1ef   : > { %3283 = vst [vmem:[%s5417_s24 + $0x48] sm:$0xff] %v3251_v35  ;;  %v3078_v12 = vadd.f32 %v2990_v51, %v5639_v58  ;;  %v5518_v47 = vpop.f32.mrf.mxu0  ;;  %v3002_v44 = vpop.f32.mrf.mxu1  ;;  %v4125_v5 = vadd.f32 %v4124_v42, %v5496_v6  ;;  %v4119_v6 = vadd.f32 %v5474_v54, %v5466_v0  ;;  %v5644_v42 = vld [vmem:[#allocation8_spill] sm:$0xff] }
 0x1f0   : > { %3288 = vst [vmem:[%s5417_s24 + $0x70] sm:$0xff] %v3256_v34  ;;  %v3254_v40 = vmax.f32 %v3222_v13, 0.0  ;;  %v3225_v61 = vadd.f32 %v5398_v41, %v3186_v19  ;;  %v3083_v26 = vadd.f32 %v3011_v28, %v5277_v17  ;;  %v3003_v22 = vadd.f32 %v4104_v11, %v3002_v44 }
 0x1f1   : > { %v3184_v38 = vmul.f32 %v5385_v2, %v3078_v12  ;;  %v5526_v49 = vpop.f32.mrf.mxu0  ;;  %v4305_v30 = vpop.f32.mrf.mxu1  ;;  %v4128_v0 = vadd.f32 %v5518_v47, %v5510_v59 }
 0x1f2   : > { %3286 = vst [vmem:[%s5417_s24 + $0x60] sm:$0xff] %v3254_v40  ;;  %v3257_v14 = vmax.f32 %v3225_v61, 0.0  ;;  %v3189_v29 = vmul.f32 %v5385_v2, %v3083_v26  ;;  %v3014_v24 = vadd.f32 %v4305_v30, %v4113_v46  ;;  %v3081_v39 = vadd.f32 %v3003_v22, %v5640_v45  ;;  %v5645_v61 = vld [vmem:[#allocation11_spill] sm:$0xff] }
 0x1f3   : > { %v3223_v1 = vadd.f32 %v5398_v41, %v3184_v38  ;;  %v5534_v15 = vpop.f32.mrf.mxu0  ;;  %v3005_v17 = vpop.f32.mrf.mxu1 }
 0x1f4   : > { %3289 = vst [vmem:[%s5417_s24 + $0x78] sm:$0xff] %v3257_v14  ;;  %v3228_v53 = vadd.f32 %v5398_v41, %v3189_v29  ;;  %v3084_v56 = vadd.f32 %v3014_v24, %v5641_v60  ;;  %v3006_v4 = vadd.f32 %v4107_v52, %v3005_v17  ;;  %v3187_v20 = vmul.f32 %v5385_v2, %v3081_v39  ;;  %v5647_v60 = vld [vmem:[#allocation14_spill] sm:$0xff] }
 0x1f5   : > { %v3255_v62 = vmax.f32 %v3223_v1, 0.0  ;;  %v4132_v33 = vpop.f32.mrf.mxu0  ;;  %v4308_v63 = vpop.f32.mrf.mxu1  ;;  %v5646_v1 = vld [vmem:[#allocation9_spill] sm:$0xff] }
 0x1f6   : > { %v3260_v55 = vmax.f32 %v3228_v53, 0.0  ;;  %v3190_v31 = vmul.f32 %v5385_v2, %v3084_v56  ;;  %v3082_v3 = vadd.f32 %v3006_v4, %v5642_v36  ;;  %v3027_v21 = vadd.f32 %v4308_v63, %v4122_v18 }
 0x1f7   : > { %3287 = vst [vmem:[%s5417_s24 + $0x68] sm:$0xff] %v3255_v62  ;;  %v3226_v25 = vadd.f32 %v5398_v41, %v3187_v20  ;;  %v4133_v9 = vpop.f32.mrf.mxu0  ;;  %v3018_v43 = vpop.f32.mrf.mxu1 }
 0x1f8   : > { %3292 = vst [vmem:[%s5417_s24 + $0x90] sm:$0xff] %v3260_v55  ;;  %v3229_v57 = vadd.f32 %v5398_v41, %v3190_v31  ;;  %v3188_v7 = vmul.f32 %v5385_v2, %v3082_v3  ;;  %v3087_v35 = vadd.f32 %v3027_v21, %v5643_v16  ;;  %v3019_v50 = vadd.f32 %v4116_v37, %v3018_v43  ;;  %v5648_v55 = vld [vmem:[#allocation12_spill] sm:$0xff] }
 0x1f9   : > { %v3258_v51 = vmax.f32 %v3226_v25, 0.0  ;;  %v4135_v34 = vpop.f32.mrf.mxu0  ;;  %v4309_v10 = vpop.f32.mrf.mxu1  ;;  %v4134_v40 = vadd.f32 %v4133_v9, %v4132_v33  ;;  %v4131_v3 = vadd.f32 %v5534_v15, %v5526_v49 }
 0x1fa   : > { %v3261_v27 = vmax.f32 %v3229_v57, 0.0  ;;  %v3227_v13 = vadd.f32 %v5398_v41, %v3188_v7  ;;  %v3193_v19 = vmul.f32 %v5385_v2, %v3087_v35  ;;  %v3030_v28 = vadd.f32 %v4309_v10, %v4125_v5  ;;  %v5649_v5 = vld [vmem:[#allocation15_spill] sm:$0xff]  ;;  %v5650_v10 = vld [vmem:[#allocation13_spill] sm:$0xff] }
 0x1fb   : > { %3290 = vst [vmem:[%s5417_s24 + $0x80] sm:$0xff] %v3258_v51  ;;  %v3085_v11 = vadd.f32 %v3019_v50, %v5644_v42  ;;  %v4136_v58 = vpop.f32.mrf.mxu0  ;;  %v3021_v12 = vpop.f32.mrf.mxu1 }
 0x1fc   : > { %3293 = vst [vmem:[%s5417_s24 + $0x98] sm:$0xff] %v3261_v27  ;;  %v3259_v44 = vmax.f32 %v3227_v13, 0.0  ;;  %v3232_v46 = vadd.f32 %v5398_v41, %v3193_v19  ;;  %v3088_v26 = vadd.f32 %v3030_v28, %v5645_v61  ;;  %v3022_v22 = vadd.f32 %v4119_v6, %v3021_v12 }
 0x1fd   : > { %v3191_v38 = vmul.f32 %v5385_v2, %v3085_v11  ;;  %v4138_v30 = vpop.f32.mrf.mxu0  ;;  %v4312_v52 = vpop.f32.mrf.mxu1  ;;  %v4137_v53 = vadd.f32 %v4136_v58, %v4135_v34 }
 0x1fe   : > { %3291 = vst [vmem:[%s5417_s24 + $0x88] sm:$0xff] %v3259_v44  ;;  %v3264_v54 = vmax.f32 %v3232_v46, 0.0  ;;  %v3194_v14 = vmul.f32 %v5385_v2, %v3088_v26  ;;  %v3043_v29 = vadd.f32 %v4312_v52, %v4134_v40  ;;  %v3086_v45 = vadd.f32 %v3022_v22, %v5646_v1 }
 0x1ff   : > { %v3230_v24 = vadd.f32 %v5398_v41, %v3191_v38  ;;  %v4139_v39 = vpop.f32.mrf.mxu0  ;;  %v3034_v17 = vpop.f32.mrf.mxu1 }
 0x200   : > { %3296 = vst [vmem:[%s5417_s24 + $0xb0] sm:$0xff] %v3264_v54  ;;  %v3233_v18 = vadd.f32 %v5398_v41, %v3194_v14  ;;  %v3091_v56 = vadd.f32 %v3043_v29, %v5647_v60  ;;  %v3035_v59 = vadd.f32 %v4128_v0, %v3034_v17  ;;  %v3192_v4 = vmul.f32 %v5385_v2, %v3086_v45 }
 0x201   : > { %v3262_v47 = vmax.f32 %v3230_v24, 0.0  ;;  %v4141_v62 = vpop.f32.mrf.mxu0  ;;  %v4313_v20 = vpop.f32.mrf.mxu1  ;;  %v4140_v49 = vadd.f32 %v4139_v39, %v4138_v30 }
 0x202   : > { %v3265_v33 = vmax.f32 %v3233_v18, 0.0  ;;  %v3197_v63 = vmul.f32 %v5385_v2, %v3091_v56  ;;  %v3089_v31 = vadd.f32 %v3035_v59, %v5648_v55  ;;  %v3046_v36 = vadd.f32 %v4313_v20, %v4137_v53 }
 0x203   : > { %3294 = vst [vmem:[%s5417_s24 + $0xa0] sm:$0xff] %v3262_v47  ;;  %v3231_v21 = vadd.f32 %v5398_v41, %v3192_v4  ;;  %v4142_v37 = vpop.f32.mrf.mxu0  ;;  %v3037_v25 = vpop.f32.mrf.mxu1 }
 0x204   : > { %3297 = vst [vmem:[%s5417_s24 + $0xb8] sm:$0xff] %v3265_v33  ;;  %v3236_v9 = vadd.f32 %v5398_v41, %v3197_v63  ;;  %v3195_v43 = vmul.f32 %v5385_v2, %v3089_v31  ;;  %v3092_v57 = vadd.f32 %v3046_v36, %v5649_v5  ;;  %v3038_v16 = vadd.f32 %v4131_v3, %v3037_v25 }
 0x205   : > { %v3263_v7 = vmax.f32 %v3231_v21, 0.0  ;;  %v4144_v35 = vpop.f32.mrf.mxu0  ;;  %v4316_v51 = vpop.f32.mrf.mxu1  ;;  %v4143_v40 = vadd.f32 %v4142_v37, %v4141_v62 }
 0x206   : > { %v3268_v50 = vmax.f32 %v3236_v9, 0.0  ;;  %v3234_v15 = vadd.f32 %v5398_v41, %v3195_v43  ;;  %v3198_v34 = vmul.f32 %v5385_v2, %v3092_v57  ;;  %v3090_v27 = vadd.f32 %v3038_v16, %v5650_v10 }
 0x207   : > { %3295 = vst [vmem:[%s5417_s24 + $0xa8] sm:$0xff] %v3263_v7  ;;  %v4145_v13 = vpop.f32.mrf.mxu0  ;;  %v3050_v19 = vpop.f32.mrf.mxu1 }
 0x208   : > { %3300 = vst [vmem:[%s5417_s24 + $0xd0] sm:$0xff] %v3268_v50  ;;  %v3266_v28 = vmax.f32 %v3234_v15, 0.0  ;;  %v3237_v6 = vadd.f32 %v5398_v41, %v3198_v34  ;;  %v4146_v42 = vadd.f32 %v4145_v13, %v4144_v35  ;;  %v3051_v11 = vadd.f32 %v4140_v49, %v3050_v19 }
 0x209   : > { %v3196_v58 = vmul.f32 %v5385_v2, %v3090_v27  ;;  %v4147_v12 = vpop.f32.mrf.mxu0  ;;  %v4317_v44 = vpop.f32.mrf.mxu1 }
 0x20a   : > { %3298 = vst [vmem:[%s5417_s24 + $0xc0] sm:$0xff] %v3266_v28  ;;  %v3269_v46 = vmax.f32 %v3237_v6, 0.0  ;;  %v3059_v61 = vadd.f32 %v4316_v51, %v4146_v42  ;;  %v3093_v26 = vadd.f32 %v3051_v11, %v5357_v8 }
 0x20b   : > { %v3235_v38 = vadd.f32 %v5398_v41, %v3196_v58  ;;  %v4148_v22 = vpop.f32.mrf.mxu0  ;;  %v3053_v30 = vpop.f32.mrf.mxu1 }
 0x20c   : > { %3301 = vst [vmem:[%s5417_s24 + $0xd8] sm:$0xff] %v3269_v46  ;;  %v3095_v52 = vadd.f32 %v3059_v61, %v5375_v32  ;;  %v3199_v0 = vmul.f32 %v5385_v2, %v3093_v26  ;;  %v4149_v54 = vadd.f32 %v4148_v22, %v4147_v12  ;;  %v3054_v14 = vadd.f32 %v4143_v40, %v3053_v30 }
 0x20d   : > { %v3267_v29 = vmax.f32 %v3235_v38, 0.0 }
 0x20e   : > { %v3201_v24 = vmul.f32 %v5385_v2, %v3095_v52  ;;  %v3238_v1 = vadd.f32 %v5398_v41, %v3199_v0  ;;  %v3062_v8 = vadd.f32 %v4317_v44, %v4149_v54  ;;  %v3094_v45 = vadd.f32 %v3054_v14, %v5365_v48 }
 0x20f   : > { %3299 = vst [vmem:[%s5417_s24 + $0xc8] sm:$0xff] %v3267_v29 }
 0x210   : > { %v3240_v39 = vadd.f32 %v5398_v41, %v3201_v24  ;;  %v3270_v17 = vmax.f32 %v3238_v1, 0.0  ;;  %v3096_v32 = vadd.f32 %v3062_v8, %v5392_v23  ;;  %v3200_v18 = vmul.f32 %v5385_v2, %v3094_v45 }
 0x212   : > { %v3272_v53 = vmax.f32 %v3240_v39, 0.0  ;;  %3302 = vst [vmem:[%s5417_s24 + $0xe0] sm:$0xff] %v3270_v17  ;;  %v3202_v60 = vmul.f32 %v5385_v2, %v3096_v32  ;;  %v3239_v56 = vadd.f32 %v5398_v41, %v3200_v18 }
 0x214   : > { %3304 = vst [vmem:[%s5417_s24 + $0xf0] sm:$0xff] %v3272_v53  ;;  %v3241_v59 = vadd.f32 %v5398_v41, %v3202_v60  ;;  %v3271_v47 = vmax.f32 %v3239_v56, 0.0 }
 0x216   : > { %v3273_v4 = vmax.f32 %v3241_v59, 0.0  ;;  %3303 = vst [vmem:[%s5417_s24 + $0xe8] sm:$0xff] %v3271_v47 }
 0x218   : > { %3305 = vst [vmem:[%s5417_s24 + $0xf8] sm:$0xff] %v3273_v4 }
 0x219 PF: > { %s14_s17 = sadd.s32 1, %s4568_s17   ;;  %s5651_s15 = smov %s4564_s16 }
 0x21a   : > { %p11_p5 = scmp.ge.s32.totalorder %s14_s17, 4   ;;  %s5652_s16 = smov %s5654_s18 }
 0x21c   :  { %13 = sbr.rel (!%p11_p5) target bundleno = 2 (0x2), region = 85 }

</bundles_post_ra>
